<compile_context>
chip_gen: v7x
topology: tpu7x:2x2x1
jax: 0.10.0
libtpu: 0.0.40
codegen_flags: <defaults>
</compile_context>

<pallas_src>
import functools

import jax
import jax.numpy as jnp
from jax.experimental import pallas as pl
from jax.experimental.pallas import tpu as pltpu

_BN_EPS = 1e-5


# ----------------------------------------------------------------------------
# Fused kernel: one generator forward (one BN batch group) per grid step.
# ----------------------------------------------------------------------------
def _generator_fused_kernel(
    x_ref,
    w0_ref, g0_ref, be0_ref,
    w1_ref, g1_ref, be1_ref,
    w2_ref, g2_ref, be2_ref,
    w3_ref, g3_ref, be3_ref,
    w4_ref, b4_ref,
    o_ref,
):
    # Noise arrives f32 (tiny); cast once for the bf16 MXU path.
    h = x_ref[...].astype(jnp.bfloat16)

    bn_layers = (
        (w0_ref, g0_ref, be0_ref),
        (w1_ref, g1_ref, be1_ref),
        (w2_ref, g2_ref, be2_ref),
        (w3_ref, g3_ref, be3_ref),
    )
    for w_ref, g_ref, be_ref in bn_layers:
        # Linear (bias dropped: exactly cancelled by the BN mean subtraction).
        # bf16 x bf16 operands, f32 accumulation.
        y = jnp.dot(h, w_ref[...], preferred_element_type=jnp.float32)
        # BatchNorm1d (training mode): biased batch stats over axis 0, f32 math.
        mean = jnp.mean(y, axis=0, keepdims=True)
        centered = y - mean
        var = jnp.mean(centered * centered, axis=0, keepdims=True)
        scale = g_ref[...] * jax.lax.rsqrt(var + _BN_EPS)   # rsqrt -> EUP slot
        # ReLU in f32; round to bf16 only as the next matmul's input.
        h = jnp.maximum(centered * scale + be_ref[...], 0.0).astype(jnp.bfloat16)

    # Final Linear -> Sigmoid (bias kept, no BN).
    y = jnp.dot(h, w4_ref[...], preferred_element_type=jnp.float32) + b4_ref[...]
    o_ref[...] = jax.nn.sigmoid(y)


def _resident_spec(shape):
    # Whole-array block with a constant index map: fetched once, then
    # VMEM-resident across every grid step (weights / BN parameters).
    return pl.BlockSpec(shape, lambda g: (0,) * len(shape))


@functools.partial(jax.jit, static_argnames=("im_dim", "num_groups"))
def _generator_pallas_impl(noise_p, params, *, im_dim, num_groups):
    bn_layers, (w4, b4) = params
    weight_inputs = []
    for (w, _b_unused, gamma, beta) in bn_layers:   # pre-BN bias dropped
        weight_inputs += [w, gamma, beta]
    weight_inputs += [w4, b4]

    n_total, z_pad = noise_p.shape
    group = n_total // num_groups
    d_out_p = w4.shape[1]

    # Advisory cost estimate for XLA scheduling around the custom call.
    flops = 0
    for (w, _b, _g, _be) in bn_layers:
        flops += 2 * n_total * w.shape[0] * w.shape[1]
    flops += 2 * n_total * w4.shape[0] * w4.shape[1]
    bytes_accessed = (noise_p.size * 4 + n_total * d_out_p * 4
                      + sum(int(a.size) * int(a.dtype.itemsize)
                            for a in weight_inputs))
    transcendentals = n_total * d_out_p + 4 * d_out_p   # sigmoid + rsqrt

    grid_spec = pltpu.PrefetchScalarGridSpec(
        num_scalar_prefetch=0,
        grid=(num_groups,),
        in_specs=[pl.BlockSpec((group, z_pad), lambda g: (g, 0))]
                 + [_resident_spec(a.shape) for a in weight_inputs],
        out_specs=pl.BlockSpec((group, d_out_p), lambda g: (g, 0)),
    )

    out = pl.pallas_call(
        _generator_fused_kernel,
        out_shape=jax.ShapeDtypeStruct((n_total, d_out_p), jnp.float32),
        grid_spec=grid_spec,
        compiler_params=pltpu.CompilerParams(
            dimension_semantics=("parallel",)),   # v7x: split groups over 2 TCs
        cost_estimate=pl.CostEstimate(
            flops=int(flops),
            transcendentals=int(transcendentals),
            bytes_accessed=int(bytes_accessed)),
    )(noise_p, *weight_inputs)

    # Slice lane padding back to the logical image dimension.
    return out[:, :im_dim]


def _pad_noise(noise, z_pad):
    n, z = noise.shape
    return jnp.zeros((n, z_pad), jnp.float32).at[:, :z].set(
        noise.astype(jnp.float32))


def generator_forward_pallas(noise, params, *, im_dim):
    """Single forward pass: BN statistics over the whole batch (module semantics)."""
    z_pad = params[0][0][0].shape[0]        # padded z_dim (rows of W0)
    noise_p = _pad_noise(noise, z_pad)
    return _generator_pallas_impl(noise_p, params, im_dim=im_dim, num_groups=1)


def generator_forward_batched_pallas(noise_batches, params, *, im_dim):
    """Many independent forward passes in one pipelined kernel.

    noise_batches: (num_batches, batch, z_dim).  Equivalent to calling the
    module once per batch (BN stats per batch); weights are DMA'd once and
    kept VMEM-resident across all batches.
    """
    nb, b, z = noise_batches.shape
    assert b % 8 == 0, "per-batch size must be a multiple of 8 (sublane tiling)"
    z_pad = params[0][0][0].shape[0]
    noise_p = _pad_noise(noise_batches.reshape(nb * b, z), z_pad)
    out = _generator_pallas_impl(noise_p, params, im_dim=im_dim, num_groups=nb)
    return out.reshape(nb, b, im_dim)


# ----------------------------------------------------------------------------
# Parameter construction (deterministic, mimics nn.Linear default init).
# Feature dims padded: z_dim -> multiple of 16 (bf16 sublanes), others ->
# multiple of 128 (lanes).  Pad rows/cols of W, beta pads and b4 pads are zero
# and gamma pads are 1, so padded lanes stay exactly zero through every layer.
# ----------------------------------------------------------------------------
def _round_up(x, m):
    return ((x + m - 1) // m) * m


def init_generator_params(key, z_dim=10, im_dim=784, hidden_dim=128):
    dims = [z_dim, hidden_dim, hidden_dim * 2, hidden_dim * 4, hidden_dim * 8, im_dim]
    pdims = [_round_up(dims[0], 16)] + [_round_up(d, 128) for d in dims[1:]]

    def make_linear(key, d_in, d_out, p_in, p_out):
        kw, kb = jax.random.split(key)
        bound = 1.0 / float(d_in) ** 0.5
        w = jax.random.uniform(kw, (d_in, d_out), jnp.float32, -bound, bound)
        b = jax.random.uniform(kb, (1, d_out), jnp.float32, -bound, bound)
        w_p = (jnp.zeros((p_in, p_out), jnp.float32)
               .at[:d_in, :d_out].set(w).astype(jnp.bfloat16))
        b_p = jnp.zeros((1, p_out), jnp.float32).at[:, :d_out].set(b)
        return w_p, b_p

    bn_layers = []
    for i in range(4):
        key, kl = jax.random.split(key)
        w_p, b_p = make_linear(kl, dims[i], dims[i + 1], pdims[i], pdims[i + 1])
        gamma_p = jnp.ones((1, pdims[i + 1]), jnp.float32)    # BatchNorm1d init
        beta_p = jnp.zeros((1, pdims[i + 1]), jnp.float32)
        bn_layers.append((w_p, b_p, gamma_p, beta_p))

    key, kl = jax.random.split(key)
    final = make_linear(kl, dims[4], dims[5], pdims[4], pdims[5])

    return (tuple(bn_layers), final)


# ----------------------------------------------------------------------------
# Pure-JAX reference.  Keeps the pre-BN Linear biases (faithful to PyTorch);
# rounds matmul input activations to bf16 exactly like the kernel so the
# comparison isolates reduction-order effects only.
# ----------------------------------------------------------------------------
def generator_forward_ref(noise, params, im_dim):
    bn_layers, (w4, b4) = params
    z_pad = bn_layers[0][0].shape[0]
    x = _pad_noise(noise, z_pad)
    for (w, b, gamma, beta) in bn_layers:
        x_r = x.astype(jnp.bfloat16).astype(jnp.float32)
        y = jnp.dot(x_r, w.astype(jnp.float32),
                    preferred_element_type=jnp.float32) + b
        mean = jnp.mean(y, axis=0, keepdims=True)
        var = jnp.mean((y - mean) ** 2, axis=0, keepdims=True)
        y = (y - mean) * jax.lax.rsqrt(var + _BN_EPS) * gamma + beta
        x = jnp.maximum(y, 0.0)
    x_r = x.astype(jnp.bfloat16).astype(jnp.float32)
    y = jnp.dot(x_r, w4.astype(jnp.float32),
                preferred_element_type=jnp.float32) + b4
    return jax.nn.sigmoid(y)[:, :im_dim]


# ----------------------------------------------------------------------------
if __name__ == "__main__":
    key = jax.random.PRNGKey(0)
    k_noise, k_params, k_noise_b = jax.random.split(key, 3)

    # Small shapes consistent with the module: batch=8, z_dim=10, hidden_dim=32,
    # im_dim=784  ->  logical dims 10 -> 32 -> 64 -> 128 -> 256 -> 784
    z_dim, im_dim, hidden_dim, batch = 10, 784, 32, 8
    params = init_generator_params(k_params, z_dim=z_dim, im_dim=im_dim,
                                   hidden_dim=hidden_dim)

    # 1) Single-batch forward (exact nn.Module semantics: BN over this batch).
    noise = jax.random.normal(k_noise, (batch, z_dim), jnp.float32)
    out = generator_forward_pallas(noise, params, im_dim=im_dim)
    out = jax.block_until_ready(out)
    ref = generator_forward_ref(noise, params, im_dim)
    assert out.shape == (batch, im_dim)
    assert bool(jnp.allclose(out, ref, atol=2e-3, rtol=2e-3)), \
        "single-batch mismatch vs JAX reference"

    # 2) Batched path: 4 independent 8-sample batches in ONE pipelined call
    #    (weights fetched once; grid axis "parallel" -> both v7x TensorCores).
    num_batches = 4
    noise_b = jax.random.normal(k_noise_b, (num_batches, batch, z_dim), jnp.float32)
    out_b = generator_forward_batched_pallas(noise_b, params, im_dim=im_dim)
    out_b = jax.block_until_ready(out_b)
    ref_b = jnp.stack([generator_forward_ref(noise_b[i], params, im_dim)
                       for i in range(num_batches)])
    assert out_b.shape == (num_batches, batch, im_dim)
    assert bool(jnp.allclose(out_b, ref_b, atol=2e-3, rtol=2e-3)), \
        "batched mismatch vs JAX reference"

    print("KERNEL_OK")
</pallas_src>

<mosaic_0001>
module attributes {stable_mosaic.version = 11 : i64} {
  func.func @_generator_fused_kernel(%arg0: i32, %arg1: memref<8x16xf32, #tpu.memory_space<vmem>>, %arg2: memref<16x128xbf16, #tpu.memory_space<vmem>>, %arg3: memref<1x128xf32, #tpu.memory_space<vmem>>, %arg4: memref<1x128xf32, #tpu.memory_space<vmem>>, %arg5: memref<128x128xbf16, #tpu.memory_space<vmem>>, %arg6: memref<1x128xf32, #tpu.memory_space<vmem>>, %arg7: memref<1x128xf32, #tpu.memory_space<vmem>>, %arg8: memref<128x128xbf16, #tpu.memory_space<vmem>>, %arg9: memref<1x128xf32, #tpu.memory_space<vmem>>, %arg10: memref<1x128xf32, #tpu.memory_space<vmem>>, %arg11: memref<128x256xbf16, #tpu.memory_space<vmem>>, %arg12: memref<1x256xf32, #tpu.memory_space<vmem>>, %arg13: memref<1x256xf32, #tpu.memory_space<vmem>>, %arg14: memref<256x896xbf16, #tpu.memory_space<vmem>>, %arg15: memref<1x896xf32, #tpu.memory_space<vmem>>, %arg16: memref<8x896xf32, #tpu.memory_space<vmem>>) attributes {dimension_semantics = [#tpu.dimension_semantics<parallel>], iteration_bounds = array<i64: 1>, scalar_prefetch = 0 : i64, scratch_operands = 0 : i64, tpu.core_type = #tpu.core_type<tc>, window_params = [{transform_indices = @transform_0, window_bounds = array<i64: 8, 16>}, {pipeline_mode = #tpu.pipeline_mode<synchronous>, transform_indices = @transform_1, window_bounds = array<i64: 16, 128>}, {pipeline_mode = #tpu.pipeline_mode<synchronous>, transform_indices = @transform_2, window_bounds = array<i64: 1, 128>}, {pipeline_mode = #tpu.pipeline_mode<synchronous>, transform_indices = @transform_3, window_bounds = array<i64: 1, 128>}, {pipeline_mode = #tpu.pipeline_mode<synchronous>, transform_indices = @transform_4, window_bounds = array<i64: 128, 128>}, {pipeline_mode = #tpu.pipeline_mode<synchronous>, transform_indices = @transform_5, window_bounds = array<i64: 1, 128>}, {pipeline_mode = #tpu.pipeline_mode<synchronous>, transform_indices = @transform_6, window_bounds = array<i64: 1, 128>}, {pipeline_mode = #tpu.pipeline_mode<synchronous>, transform_indices = @transform_7, window_bounds = array<i64: 128, 128>}, {pipeline_mode = #tpu.pipeline_mode<synchronous>, transform_indices = @transform_8, window_bounds = array<i64: 1, 128>}, {pipeline_mode = #tpu.pipeline_mode<synchronous>, transform_indices = @transform_9, window_bounds = array<i64: 1, 128>}, {pipeline_mode = #tpu.pipeline_mode<synchronous>, transform_indices = @transform_10, window_bounds = array<i64: 128, 256>}, {pipeline_mode = #tpu.pipeline_mode<synchronous>, transform_indices = @transform_11, window_bounds = array<i64: 1, 256>}, {pipeline_mode = #tpu.pipeline_mode<synchronous>, transform_indices = @transform_12, window_bounds = array<i64: 1, 256>}, {pipeline_mode = #tpu.pipeline_mode<synchronous>, transform_indices = @transform_13, window_bounds = array<i64: 256, 896>}, {pipeline_mode = #tpu.pipeline_mode<synchronous>, transform_indices = @transform_14, window_bounds = array<i64: 1, 896>}, {transform_indices = @transform_15, window_bounds = array<i64: 8, 896>}]} {
    %c0 = arith.constant 0 : index
    %c0_0 = arith.constant 0 : index
    %0 = vector.load %arg1[%c0, %c0_0] : memref<8x16xf32, #tpu.memory_space<vmem>>, vector<8x16xf32>
    %1 = arith.truncf %0 : vector<8x16xf32> to vector<8x16xbf16>
    %c0_1 = arith.constant 0 : index
    %c0_2 = arith.constant 0 : index
    %2 = vector.load %arg2[%c0_1, %c0_2] : memref<16x128xbf16, #tpu.memory_space<vmem>>, vector<16x128xbf16>
    %cst = arith.constant dense<0.000000e+00> : vector<8x128xf32>
    %3 = tpu.matmul %1, %2, %cst {dimension_numbers = #tpu.dot_dimension_numbers<[1], [0], [0], [1], [0, 0, 1, 1], [], []>} : vector<8x16xbf16>, vector<16x128xbf16>, vector<8x128xf32> -> vector<8x128xf32>
    %cst_3 = arith.constant dense<0.000000e+00> : vector<128xf32>
    %4 = vector.multi_reduction <add>, %3, %cst_3 [0] : vector<8x128xf32> to vector<128xf32>
    %5 = vector.shape_cast %4 : vector<128xf32> to vector<1x128xf32>
    %cst_4 = arith.constant 8.000000e+00 : f32
    %6 = vector.broadcast %cst_4 : f32 to vector<1x128xf32>
    %7 = arith.divf %5, %6 : vector<1x128xf32>
    %8 = vector.broadcast %7 : vector<1x128xf32> to vector<8x128xf32>
    %9 = arith.subf %3, %8 : vector<8x128xf32>
    %10 = arith.mulf %9, %9 : vector<8x128xf32>
    %cst_5 = arith.constant dense<0.000000e+00> : vector<128xf32>
    %11 = vector.multi_reduction <add>, %10, %cst_5 [0] : vector<8x128xf32> to vector<128xf32>
    %12 = vector.shape_cast %11 : vector<128xf32> to vector<1x128xf32>
    %cst_6 = arith.constant 8.000000e+00 : f32
    %13 = vector.broadcast %cst_6 : f32 to vector<1x128xf32>
    %14 = arith.divf %12, %13 : vector<1x128xf32>
    %c0_7 = arith.constant 0 : index
    %c0_8 = arith.constant 0 : index
    %15 = vector.load %arg3[%c0_7, %c0_8] : memref<1x128xf32, #tpu.memory_space<vmem>>, vector<1x128xf32>
    %cst_9 = arith.constant 9.99999974E-6 : f32
    %16 = vector.broadcast %cst_9 : f32 to vector<1x128xf32>
    %17 = arith.addf %14, %16 : vector<1x128xf32>
    %18 = math.rsqrt %17 : vector<1x128xf32>
    %19 = arith.mulf %15, %18 : vector<1x128xf32>
    %20 = vector.broadcast %19 : vector<1x128xf32> to vector<8x128xf32>
    %21 = arith.mulf %9, %20 : vector<8x128xf32>
    %c0_10 = arith.constant 0 : index
    %c0_11 = arith.constant 0 : index
    %22 = vector.load %arg4[%c0_10, %c0_11] : memref<1x128xf32, #tpu.memory_space<vmem>>, vector<1x128xf32>
    %23 = vector.broadcast %22 : vector<1x128xf32> to vector<8x128xf32>
    %24 = arith.addf %21, %23 : vector<8x128xf32>
    %cst_12 = arith.constant 0.000000e+00 : f32
    %25 = vector.broadcast %cst_12 : f32 to vector<8x128xf32>
    %26 = arith.maximumf %24, %25 : vector<8x128xf32>
    %27 = arith.truncf %26 : vector<8x128xf32> to vector<8x128xbf16>
    %c0_13 = arith.constant 0 : index
    %c0_14 = arith.constant 0 : index
    %28 = vector.load %arg5[%c0_13, %c0_14] : memref<128x128xbf16, #tpu.memory_space<vmem>>, vector<128x128xbf16>
    %cst_15 = arith.constant dense<0.000000e+00> : vector<8x128xf32>
    %29 = tpu.matmul %27, %28, %cst_15 {dimension_numbers = #tpu.dot_dimension_numbers<[1], [0], [0], [1], [0, 0, 1, 1], [], []>} : vector<8x128xbf16>, vector<128x128xbf16>, vector<8x128xf32> -> vector<8x128xf32>
    %cst_16 = arith.constant dense<0.000000e+00> : vector<128xf32>
    %30 = vector.multi_reduction <add>, %29, %cst_16 [0] : vector<8x128xf32> to vector<128xf32>
    %31 = vector.shape_cast %30 : vector<128xf32> to vector<1x128xf32>
    %cst_17 = arith.constant 8.000000e+00 : f32
    %32 = vector.broadcast %cst_17 : f32 to vector<1x128xf32>
    %33 = arith.divf %31, %32 : vector<1x128xf32>
    %34 = vector.broadcast %33 : vector<1x128xf32> to vector<8x128xf32>
    %35 = arith.subf %29, %34 : vector<8x128xf32>
    %36 = arith.mulf %35, %35 : vector<8x128xf32>
    %cst_18 = arith.constant dense<0.000000e+00> : vector<128xf32>
    %37 = vector.multi_reduction <add>, %36, %cst_18 [0] : vector<8x128xf32> to vector<128xf32>
    %38 = vector.shape_cast %37 : vector<128xf32> to vector<1x128xf32>
    %cst_19 = arith.constant 8.000000e+00 : f32
    %39 = vector.broadcast %cst_19 : f32 to vector<1x128xf32>
    %40 = arith.divf %38, %39 : vector<1x128xf32>
    %c0_20 = arith.constant 0 : index
    %c0_21 = arith.constant 0 : index
    %41 = vector.load %arg6[%c0_20, %c0_21] : memref<1x128xf32, #tpu.memory_space<vmem>>, vector<1x128xf32>
    %cst_22 = arith.constant 9.99999974E-6 : f32
    %42 = vector.broadcast %cst_22 : f32 to vector<1x128xf32>
    %43 = arith.addf %40, %42 : vector<1x128xf32>
    %44 = math.rsqrt %43 : vector<1x128xf32>
    %45 = arith.mulf %41, %44 : vector<1x128xf32>
    %46 = vector.broadcast %45 : vector<1x128xf32> to vector<8x128xf32>
    %47 = arith.mulf %35, %46 : vector<8x128xf32>
    %c0_23 = arith.constant 0 : index
    %c0_24 = arith.constant 0 : index
    %48 = vector.load %arg7[%c0_23, %c0_24] : memref<1x128xf32, #tpu.memory_space<vmem>>, vector<1x128xf32>
    %49 = vector.broadcast %48 : vector<1x128xf32> to vector<8x128xf32>
    %50 = arith.addf %47, %49 : vector<8x128xf32>
    %cst_25 = arith.constant 0.000000e+00 : f32
    %51 = vector.broadcast %cst_25 : f32 to vector<8x128xf32>
    %52 = arith.maximumf %50, %51 : vector<8x128xf32>
    %53 = arith.truncf %52 : vector<8x128xf32> to vector<8x128xbf16>
    %c0_26 = arith.constant 0 : index
    %c0_27 = arith.constant 0 : index
    %54 = vector.load %arg8[%c0_26, %c0_27] : memref<128x128xbf16, #tpu.memory_space<vmem>>, vector<128x128xbf16>
    %cst_28 = arith.constant dense<0.000000e+00> : vector<8x128xf32>
    %55 = tpu.matmul %53, %54, %cst_28 {dimension_numbers = #tpu.dot_dimension_numbers<[1], [0], [0], [1], [0, 0, 1, 1], [], []>} : vector<8x128xbf16>, vector<128x128xbf16>, vector<8x128xf32> -> vector<8x128xf32>
    %cst_29 = arith.constant dense<0.000000e+00> : vector<128xf32>
    %56 = vector.multi_reduction <add>, %55, %cst_29 [0] : vector<8x128xf32> to vector<128xf32>
    %57 = vector.shape_cast %56 : vector<128xf32> to vector<1x128xf32>
    %cst_30 = arith.constant 8.000000e+00 : f32
    %58 = vector.broadcast %cst_30 : f32 to vector<1x128xf32>
    %59 = arith.divf %57, %58 : vector<1x128xf32>
    %60 = vector.broadcast %59 : vector<1x128xf32> to vector<8x128xf32>
    %61 = arith.subf %55, %60 : vector<8x128xf32>
    %62 = arith.mulf %61, %61 : vector<8x128xf32>
    %cst_31 = arith.constant dense<0.000000e+00> : vector<128xf32>
    %63 = vector.multi_reduction <add>, %62, %cst_31 [0] : vector<8x128xf32> to vector<128xf32>
    %64 = vector.shape_cast %63 : vector<128xf32> to vector<1x128xf32>
    %cst_32 = arith.constant 8.000000e+00 : f32
    %65 = vector.broadcast %cst_32 : f32 to vector<1x128xf32>
    %66 = arith.divf %64, %65 : vector<1x128xf32>
    %c0_33 = arith.constant 0 : index
    %c0_34 = arith.constant 0 : index
    %67 = vector.load %arg9[%c0_33, %c0_34] : memref<1x128xf32, #tpu.memory_space<vmem>>, vector<1x128xf32>
    %cst_35 = arith.constant 9.99999974E-6 : f32
    %68 = vector.broadcast %cst_35 : f32 to vector<1x128xf32>
    %69 = arith.addf %66, %68 : vector<1x128xf32>
    %70 = math.rsqrt %69 : vector<1x128xf32>
    %71 = arith.mulf %67, %70 : vector<1x128xf32>
    %72 = vector.broadcast %71 : vector<1x128xf32> to vector<8x128xf32>
    %73 = arith.mulf %61, %72 : vector<8x128xf32>
    %c0_36 = arith.constant 0 : index
    %c0_37 = arith.constant 0 : index
    %74 = vector.load %arg10[%c0_36, %c0_37] : memref<1x128xf32, #tpu.memory_space<vmem>>, vector<1x128xf32>
    %75 = vector.broadcast %74 : vector<1x128xf32> to vector<8x128xf32>
    %76 = arith.addf %73, %75 : vector<8x128xf32>
    %cst_38 = arith.constant 0.000000e+00 : f32
    %77 = vector.broadcast %cst_38 : f32 to vector<8x128xf32>
    %78 = arith.maximumf %76, %77 : vector<8x128xf32>
    %79 = arith.truncf %78 : vector<8x128xf32> to vector<8x128xbf16>
    %c0_39 = arith.constant 0 : index
    %c0_40 = arith.constant 0 : index
    %80 = vector.load %arg11[%c0_39, %c0_40] : memref<128x256xbf16, #tpu.memory_space<vmem>>, vector<128x256xbf16>
    %cst_41 = arith.constant dense<0.000000e+00> : vector<8x256xf32>
    %81 = tpu.matmul %79, %80, %cst_41 {dimension_numbers = #tpu.dot_dimension_numbers<[1], [0], [0], [1], [0, 0, 1, 1], [], []>} : vector<8x128xbf16>, vector<128x256xbf16>, vector<8x256xf32> -> vector<8x256xf32>
    %cst_42 = arith.constant dense<0.000000e+00> : vector<256xf32>
    %82 = vector.multi_reduction <add>, %81, %cst_42 [0] : vector<8x256xf32> to vector<256xf32>
    %83 = vector.shape_cast %82 : vector<256xf32> to vector<1x256xf32>
    %cst_43 = arith.constant 8.000000e+00 : f32
    %84 = vector.broadcast %cst_43 : f32 to vector<1x256xf32>
    %85 = arith.divf %83, %84 : vector<1x256xf32>
    %86 = vector.broadcast %85 : vector<1x256xf32> to vector<8x256xf32>
    %87 = arith.subf %81, %86 : vector<8x256xf32>
    %88 = arith.mulf %87, %87 : vector<8x256xf32>
    %cst_44 = arith.constant dense<0.000000e+00> : vector<256xf32>
    %89 = vector.multi_reduction <add>, %88, %cst_44 [0] : vector<8x256xf32> to vector<256xf32>
    %90 = vector.shape_cast %89 : vector<256xf32> to vector<1x256xf32>
    %cst_45 = arith.constant 8.000000e+00 : f32
    %91 = vector.broadcast %cst_45 : f32 to vector<1x256xf32>
    %92 = arith.divf %90, %91 : vector<1x256xf32>
    %c0_46 = arith.constant 0 : index
    %c0_47 = arith.constant 0 : index
    %93 = vector.load %arg12[%c0_46, %c0_47] : memref<1x256xf32, #tpu.memory_space<vmem>>, vector<1x256xf32>
    %cst_48 = arith.constant 9.99999974E-6 : f32
    %94 = vector.broadcast %cst_48 : f32 to vector<1x256xf32>
    %95 = arith.addf %92, %94 : vector<1x256xf32>
    %96 = math.rsqrt %95 : vector<1x256xf32>
    %97 = arith.mulf %93, %96 : vector<1x256xf32>
    %98 = vector.broadcast %97 : vector<1x256xf32> to vector<8x256xf32>
    %99 = arith.mulf %87, %98 : vector<8x256xf32>
    %c0_49 = arith.constant 0 : index
    %c0_50 = arith.constant 0 : index
    %100 = vector.load %arg13[%c0_49, %c0_50] : memref<1x256xf32, #tpu.memory_space<vmem>>, vector<1x256xf32>
    %101 = vector.broadcast %100 : vector<1x256xf32> to vector<8x256xf32>
    %102 = arith.addf %99, %101 : vector<8x256xf32>
    %cst_51 = arith.constant 0.000000e+00 : f32
    %103 = vector.broadcast %cst_51 : f32 to vector<8x256xf32>
    %104 = arith.maximumf %102, %103 : vector<8x256xf32>
    %105 = arith.truncf %104 : vector<8x256xf32> to vector<8x256xbf16>
    %c0_52 = arith.constant 0 : index
    %c0_53 = arith.constant 0 : index
    %106 = vector.load %arg14[%c0_52, %c0_53] : memref<256x896xbf16, #tpu.memory_space<vmem>>, vector<256x896xbf16>
    %cst_54 = arith.constant dense<0.000000e+00> : vector<8x896xf32>
    %107 = tpu.matmul %105, %106, %cst_54 {dimension_numbers = #tpu.dot_dimension_numbers<[1], [0], [0], [1], [0, 0, 1, 1], [], []>} : vector<8x256xbf16>, vector<256x896xbf16>, vector<8x896xf32> -> vector<8x896xf32>
    %c0_55 = arith.constant 0 : index
    %c0_56 = arith.constant 0 : index
    %108 = vector.load %arg15[%c0_55, %c0_56] : memref<1x896xf32, #tpu.memory_space<vmem>>, vector<1x896xf32>
    %109 = vector.broadcast %108 : vector<1x896xf32> to vector<8x896xf32>
    %110 = arith.addf %107, %109 : vector<8x896xf32>
    %111 = arith.negf %110 : vector<8x896xf32>
    %112 = math.exp %111 : vector<8x896xf32>
    %cst_57 = arith.constant 1.000000e+00 : f32
    %113 = vector.broadcast %cst_57 : f32 to vector<8x896xf32>
    %114 = arith.addf %113, %112 : vector<8x896xf32>
    %115 = arith.divf %113, %114 : vector<8x896xf32>
    %c0_58 = arith.constant 0 : index
    %c0_59 = arith.constant 0 : index
    %116 = vector.load %arg16[%c0_58, %c0_59] : memref<8x896xf32, #tpu.memory_space<vmem>>, vector<8x896xf32>
    tpu.vector_store %arg16[%c0_58, %c0_59], %115 {strides = array<i32>} : memref<8x896xf32, #tpu.memory_space<vmem>>, vector<8x896xf32>,
    return
  }
  func.func @transform_0(%arg0: i32) -> (i32, i32) {
    %c0_i32 = arith.constant 0 : i32
    %c0_i32_0 = arith.constant 0 : i32
    return %arg0, %c0_i32 : i32, i32
  }
  func.func @transform_1(%arg0: i32) -> (i32, i32) {
    %c0_i32 = arith.constant 0 : i32
    %c0_i32_0 = arith.constant 0 : i32
    %c0_i32_1 = arith.constant 0 : i32
    return %c0_i32, %c0_i32_0 : i32, i32
  }
  func.func @transform_2(%arg0: i32) -> (i32, i32) {
    %c0_i32 = arith.constant 0 : i32
    %c0_i32_0 = arith.constant 0 : i32
    %c0_i32_1 = arith.constant 0 : i32
    return %c0_i32, %c0_i32_0 : i32, i32
  }
  func.func @transform_3(%arg0: i32) -> (i32, i32) {
    %c0_i32 = arith.constant 0 : i32
    %c0_i32_0 = arith.constant 0 : i32
    %c0_i32_1 = arith.constant 0 : i32
    return %c0_i32, %c0_i32_0 : i32, i32
  }
  func.func @transform_4(%arg0: i32) -> (i32, i32) {
    %c0_i32 = arith.constant 0 : i32
    %c0_i32_0 = arith.constant 0 : i32
    %c0_i32_1 = arith.constant 0 : i32
    return %c0_i32, %c0_i32_0 : i32, i32
  }
  func.func @transform_5(%arg0: i32) -> (i32, i32) {
    %c0_i32 = arith.constant 0 : i32
    %c0_i32_0 = arith.constant 0 : i32
    %c0_i32_1 = arith.constant 0 : i32
    return %c0_i32, %c0_i32_0 : i32, i32
  }
  func.func @transform_6(%arg0: i32) -> (i32, i32) {
    %c0_i32 = arith.constant 0 : i32
    %c0_i32_0 = arith.constant 0 : i32
    %c0_i32_1 = arith.constant 0 : i32
    return %c0_i32, %c0_i32_0 : i32, i32
  }
  func.func @transform_7(%arg0: i32) -> (i32, i32) {
    %c0_i32 = arith.constant 0 : i32
    %c0_i32_0 = arith.constant 0 : i32
    %c0_i32_1 = arith.constant 0 : i32
    return %c0_i32, %c0_i32_0 : i32, i32
  }
  func.func @transform_8(%arg0: i32) -> (i32, i32) {
    %c0_i32 = arith.constant 0 : i32
    %c0_i32_0 = arith.constant 0 : i32
    %c0_i32_1 = arith.constant 0 : i32
    return %c0_i32, %c0_i32_0 : i32, i32
  }
  func.func @transform_9(%arg0: i32) -> (i32, i32) {
    %c0_i32 = arith.constant 0 : i32
    %c0_i32_0 = arith.constant 0 : i32
    %c0_i32_1 = arith.constant 0 : i32
    return %c0_i32, %c0_i32_0 : i32, i32
  }
  func.func @transform_10(%arg0: i32) -> (i32, i32) {
    %c0_i32 = arith.constant 0 : i32
    %c0_i32_0 = arith.constant 0 : i32
    %c0_i32_1 = arith.constant 0 : i32
    return %c0_i32, %c0_i32_0 : i32, i32
  }
  func.func @transform_11(%arg0: i32) -> (i32, i32) {
    %c0_i32 = arith.constant 0 : i32
    %c0_i32_0 = arith.constant 0 : i32
    %c0_i32_1 = arith.constant 0 : i32
    return %c0_i32, %c0_i32_0 : i32, i32
  }
  func.func @transform_12(%arg0: i32) -> (i32, i32) {
    %c0_i32 = arith.constant 0 : i32
    %c0_i32_0 = arith.constant 0 : i32
    %c0_i32_1 = arith.constant 0 : i32
    return %c0_i32, %c0_i32_0 : i32, i32
  }
  func.func @transform_13(%arg0: i32) -> (i32, i32) {
    %c0_i32 = arith.constant 0 : i32
    %c0_i32_0 = arith.constant 0 : i32
    %c0_i32_1 = arith.constant 0 : i32
    return %c0_i32, %c0_i32_0 : i32, i32
  }
  func.func @transform_14(%arg0: i32) -> (i32, i32) {
    %c0_i32 = arith.constant 0 : i32
    %c0_i32_0 = arith.constant 0 : i32
    %c0_i32_1 = arith.constant 0 : i32
    return %c0_i32, %c0_i32_0 : i32, i32
  }
  func.func @transform_15(%arg0: i32) -> (i32, i32) {
    %c0_i32 = arith.constant 0 : i32
    %c0_i32_0 = arith.constant 0 : i32
    return %arg0, %c0_i32 : i32, i32
  }
}

</mosaic_0001>

<bundles_post_ra>
// kernel: _generator_pallas_impl.1
= control target key start
LH: loop header
LB: loop body
LE: loop exit
PB: predicated region body
PF: predicated region fallthrough
CT: control target
= control target key end

     0   :  { %s2631_s0 = inlined_call_operand.hbm [shape: f32[8,16], index: 0, kind: input, shape index: {}]   ;;  %s2632_s1 = inlined_call_operand.hbm [shape: bf16[16,128], index: 1, kind: input, shape index: {}]   ;;  %s2633_s2 = inlined_call_operand.vmem [shape: f32[1,128], index: 2, kind: input, shape index: {}]   ;;  %s2634_s3 = inlined_call_operand.vmem [shape: f32[1,128], index: 3, kind: input, shape index: {}]   ;;  %s2635_s4 = inlined_call_operand.hbm [shape: bf16[128,128], index: 4, kind: input, shape index: {}]   ;;  %s2636_s5 = inlined_call_operand.vmem [shape: f32[1,128], index: 5, kind: input, shape index: {}]   ;;  %s2637_s6 = inlined_call_operand.vmem [shape: f32[1,128], index: 6, kind: input, shape index: {}]   ;;  %s2638_s7 = inlined_call_operand.hbm [shape: bf16[128,128], index: 7, kind: input, shape index: {}]   ;;  %s2639_s8 = inlined_call_operand.vmem [shape: f32[1,128], index: 8, kind: input, shape index: {}]   ;;  %s2640_s9 = inlined_call_operand.vmem [shape: f32[1,128], index: 9, kind: input, shape index: {}]   ;;  %s2641_s10 = inlined_call_operand.hbm [shape: bf16[128,256], index: 10, kind: input, shape index: {}]   ;;  %s2642_s11 = inlined_call_operand.vmem [shape: f32[1,256], index: 11, kind: input, shape index: {}]   ;;  %s2643_s12 = inlined_call_operand.vmem [shape: f32[1,256], index: 12, kind: input, shape index: {}]   ;;  %s2644_s13 = inlined_call_operand.hbm [shape: bf16[256,896], index: 13, kind: input, shape index: {}]   ;;  %s2645_s14 = inlined_call_operand.vmem [shape: f32[1,896], index: 14, kind: input, shape index: {}]   ;;  %s2646_s15 = inlined_call_operand.hbm [shape: f32[8,896], index: 15, kind: output, shape index: {}]  }
   0x1   :  { %2648 = sst [smem:[#allocation19_spill]] %s2646_s15 }
   0x2   :  { %20 = vsyncpa [#allocation3], 0 }
   0x3   :  { %21 = vsyncpa [#allocation6], 0 }
   0x4   :  { %22 = vsyncpa [#allocation9], 0 }
   0x5   :  { %23 = vsyncpa [#allocation12], 0 }
   0x6   :  { %24 = vsyncpa [#allocation4], 0  ;;  %s2365_s18 = smov [#allocation5]   ;;  %s2201_s22 = scalar_lea.hbm %s2632_s1, 128 }
   0x7   :  { %s40_s19 = sshll.u32 %s2365_s18, 4  ;;  %p2202_p0 = scmp.ne.s32.totalorder %s2632_s1, %s2201_s22  ;;  %s41_s19 = int_to_ptr.vmem [resolvable:$true] %s40_s19 }
   0x8   :  { %p2205_p1 = scmp.lt.u32.totalorder %s2201_s22, %s2632_s1 }
   0xa   :  { %p2207_p2 = pnand %p2205_p1, %p2202_p0 }
   0xc   :  { %2210 = shalt.err (!%p2207_p2)
}
   0xd   :  { %s2211_s27 = scalar_lea.vmem %s41_s19, 128  ;;  %p2216_p4 = scmp.lt.s32.totalorder %s41_s19, %s41_s19 }
   0xe   :  { %p2212_p3 = scmp.ne.s32.totalorder %s41_s19, %s2211_s27  ;;  %p2217_p5 = scmp.lt.s32.totalorder %s2211_s27, %s2211_s27 }
  0x10   :  { %p2218_p6 = por %p2217_p5, %p2216_p4 }
  0x12   :  { %p2219_p7 = pnand %p2218_p6, %p2212_p3 }
  0x14   :  { %2222 = shalt.err (!%p2219_p7)
}
  0x15   :  { %s2366_s28 = smov 64   ;;  %s2367_s29 = smov 4  }
  0x16   :  { %46 = dma.hbm_to_vmem [thread:$0]  %s2632_s1, 128, %s41_s19, [#allocation6], %s2366_s28, %s2366_s28, %s2367_s29  }
  0x17   :  { %s2368_s17 = smov [#allocation8]   ;;  %s2369_s20 = smov [#allocation2]  }
  0x18   :  { %s72_s18 = sshll.u32 %s2368_s17, 4  ;;  %s31_s21 = sshll.u32 %s2369_s20, 4  ;;  %s73_s18 = int_to_ptr.vmem [resolvable:$true] %s72_s18  ;;  %s32_s21 = int_to_ptr.vmem [resolvable:$true] %s31_s21 }
  0x19   :  { %s2223_s24 = scalar_lea.hbm %s2638_s7, 1024 }
  0x1a   :  { %p2224_p8 = scmp.ne.s32.totalorder %s2638_s7, %s2223_s24  ;;  %p2227_p9 = scmp.lt.u32.totalorder %s2223_s24, %s2638_s7 }
  0x1c   :  { %p2229_p10 = pnand %p2227_p9, %p2224_p8 }
  0x1e   :  { %2232 = shalt.err (!%p2229_p10)
}
  0x1f   :  { %s2233_s1 = scalar_lea.vmem %s73_s18, 1024  ;;  %p2238_p12 = scmp.lt.s32.totalorder %s73_s18, %s73_s18 }
  0x20   :  { %p2234_p11 = scmp.ne.s32.totalorder %s73_s18, %s2233_s1  ;;  %p2239_p13 = scmp.lt.s32.totalorder %s2233_s1, %s2233_s1 }
  0x22   :  { %p2240_p0 = por %p2239_p13, %p2238_p12 }
  0x24   :  { %p2241_p1 = pnand %p2240_p0, %p2234_p11 }
  0x26   :  { %2244 = shalt.err (!%p2241_p1)
}
  0x27   :  { %78 = dma.hbm_to_vmem [thread:$0]  %s2638_s7, 1024, %s73_s18, [#allocation9], %s2366_s28, %s2366_s28, %s2367_s29  }
  0x28   :  { %s2245_s17 = scalar_lea.hbm %s2631_s0, 128 }
  0x29   :  { %p2246_p2 = scmp.ne.s32.totalorder %s2631_s0, %s2245_s17  ;;  %p2249_p3 = scmp.lt.u32.totalorder %s2245_s17, %s2631_s0 }
  0x2b   :  { %p2251_p4 = pnand %p2249_p3, %p2246_p2 }
  0x2d   :  { %2254 = shalt.err (!%p2251_p4)
}
  0x2e   :  { %s2255_s25 = scalar_lea.vmem %s32_s21, 128  ;;  %p2260_p6 = scmp.lt.s32.totalorder %s32_s21, %s32_s21 }
  0x2f   :  { %p2256_p5 = scmp.ne.s32.totalorder %s32_s21, %s2255_s25  ;;  %p2261_p7 = scmp.lt.s32.totalorder %s2255_s25, %s2255_s25 }
  0x31   :  { %p2262_p8 = por %p2261_p7, %p2260_p6 }
  0x33   :  { %p2263_p9 = pnand %p2262_p8, %p2256_p5 }
  0x35   :  { %2266 = shalt.err (!%p2263_p9)
}
  0x36   :  { %34 = dma.hbm_to_vmem [thread:$0]  %s2631_s0, 128, %s32_s21, [#allocation3]  }
  0x37   :  { %s2370_s26 = smov [#allocation7]   ;;  %s2371_s1 = smov [#allocation10]  }
  0x38   :  { %s56_s27 = sshll.u32 %s2370_s26, 4  ;;  %s88_s19 = sshll.u32 %s2371_s1, 4  ;;  %s57_s27 = int_to_ptr.vmem [resolvable:$true] %s56_s27  ;;  %s89_s19 = int_to_ptr.vmem [resolvable:$true] %s88_s19 }
  0x39   :  { %s2267_s15 = scalar_lea.hbm %s2635_s4, 1024 }
  0x3a   :  { %p2268_p10 = scmp.ne.s32.totalorder %s2635_s4, %s2267_s15  ;;  %p2271_p11 = scmp.lt.u32.totalorder %s2267_s15, %s2635_s4 }
  0x3c   :  { %p2273_p12 = pnand %p2271_p11, %p2268_p10 }
  0x3e   :  { %2276 = shalt.err (!%p2273_p12)
}
  0x3f   :  { %s2277_s0 = scalar_lea.vmem %s57_s27, 1024  ;;  %p2282_p0 = scmp.lt.s32.totalorder %s57_s27, %s57_s27 }
  0x40   :  { %p2278_p13 = scmp.ne.s32.totalorder %s57_s27, %s2277_s0  ;;  %p2283_p1 = scmp.lt.s32.totalorder %s2277_s0, %s2277_s0 }
  0x42   :  { %p2284_p2 = por %p2283_p1, %p2282_p0 }
  0x44   :  { %p2285_p3 = pnand %p2284_p2, %p2278_p13 }
  0x46   :  { %2288 = shalt.err (!%p2285_p3)
}
  0x47   :  { %62 = dma.hbm_to_vmem [thread:$0]  %s2635_s4, 1024, %s57_s27, [#allocation6], %s2366_s28, %s2366_s28, %s2367_s29  }
  0x48   :  { %s2289_s18 = scalar_lea.hbm %s2641_s10, 2048 }
  0x49   :  { %p2290_p4 = scmp.ne.s32.totalorder %s2641_s10, %s2289_s18  ;;  %p2293_p5 = scmp.lt.u32.totalorder %s2289_s18, %s2641_s10 }
  0x4b   :  { %p2295_p6 = pnand %p2293_p5, %p2290_p4 }
  0x4d   :  { %2298 = shalt.err (!%p2295_p6)
}
  0x4e   :  { %s2299_s15 = scalar_lea.vmem %s89_s19, 2048  ;;  %p2304_p8 = scmp.lt.s32.totalorder %s89_s19, %s89_s19 }
  0x4f   :  { %p2300_p7 = scmp.ne.s32.totalorder %s89_s19, %s2299_s15  ;;  %p2305_p9 = scmp.lt.s32.totalorder %s2299_s15, %s2299_s15 }
  0x51   :  { %p2306_p10 = por %p2305_p9, %p2304_p8 }
  0x53   :  { %p2307_p11 = pnand %p2306_p10, %p2300_p7 }
  0x55   :  { %2310 = shalt.err (!%p2307_p11)
}
  0x56   :  { %s2372_s4 = smov 128   ;;  %s2373_s28 = smov 8  }
  0x57   :  { %94 = dma.hbm_to_vmem [thread:$0]  %s2641_s10, 2048, %s89_s19, [#allocation9], %s2372_s4, %s2372_s4, %s2373_s28  }
  0x58   :  { %s2374_s17 = smov [#allocation11]   ;;  %s2311_s0 = scalar_lea.hbm %s2644_s13, 14336 }
  0x59   :  { %s104_s20 = sshll.u32 %s2374_s17, 4  ;;  %p2312_p12 = scmp.ne.s32.totalorder %s2644_s13, %s2311_s0  ;;  %s105_s20 = int_to_ptr.vmem [resolvable:$true] %s104_s20 }
  0x5a   :  { %p2315_p13 = scmp.lt.u32.totalorder %s2311_s0, %s2644_s13 }
  0x5c   :  { %p2317_p0 = pnand %p2315_p13, %p2312_p12 }
  0x5e   :  { %2320 = shalt.err (!%p2317_p0)
}
  0x5f   :  { %s2321_s18 = scalar_lea.vmem %s105_s20, 14336  ;;  %p2326_p2 = scmp.lt.s32.totalorder %s105_s20, %s105_s20 }
  0x60   :  { %p2322_p1 = scmp.ne.s32.totalorder %s105_s20, %s2321_s18  ;;  %p2327_p3 = scmp.lt.s32.totalorder %s2321_s18, %s2321_s18 }
  0x62   :  { %p2328_p4 = por %p2327_p3, %p2326_p2 }
  0x64   :  { %p2329_p5 = pnand %p2328_p4, %p2322_p1 }
  0x66   :  { %2332 = shalt.err (!%p2329_p5)
}
  0x67   :  { %s2375_s10 = smov 448   ;;  %s2376_s19 = smov 28  }
  0x68   :  { %110 = dma.hbm_to_vmem [thread:$0]  %s2644_s13, 14336, %s105_s20, [#allocation12], %s2375_s10, %s2375_s10, %s2376_s19  }
  0x69   :  { %2355 = dma.done.wait [#allocation3], 128  }
  0x6a   :  { %2356 = vsyncadd [#allocation3], 4294967168 }
  0x6b   :  { %2357 = dma.done.wait [#allocation6], 1152  }
  0x6c   :  { %2358 = vsyncadd [#allocation6], 4294966144 }
  0x6d   :  { %2359 = dma.done.wait [#allocation9], 3072  }
  0x6e   :  { %2360 = vsyncadd [#allocation9], 4294964224 }
  0x6f   :  { %2361 = dma.done.wait [#allocation12], 14336  }
  0x70   :  { %2362 = vsyncadd [#allocation12], 4294952960  ;;  %v2377_v0 = vmov 0.0   ;;  %vm2378_vm0 = vmmov 0   ;;  %v1962_v1 = vld [vmem:[#allocation5] sm:$0xff]   ;;  %v132_v2 = vld [vmem:[#allocation2] sm:$0xff]  ;;  %v208_v33 = vlaneseq }
  0x71   :  { %1899 = vmatprep.subr.bf16.mxu0 %v2377_v0  ;;  %1901 = vmatprep.mubr.msk.bf16.mxu0 %vm2378_vm0, %v2377_v0  ;;  %vm142_vm1 = vcmask 130048   ;;  %v133_v3 = vpack.c.bf16 %v132_v2, %v132_v2  ;;  %v1963_v4 = vld [vmem:[#allocation7] sm:$0xff]   ;;  %v1964_v5 = vld [vmem:[#allocation7 + $0x8] sm:$0xff]   ;;  %v1965_v6 = vld [vmem:[#allocation7 + $0x10] sm:$0xff]  }
  0x72   :  { %1905 = vmatprep.subr.bf16.mxu1 %v2377_v0  ;;  %1921 = vmatprep.mubr.msk.bf16.mxu1 %vm2378_vm0, %v2377_v0  ;;  %v1966_v7 = vld [vmem:[#allocation7 + $0x18] sm:$0xff]   ;;  %v1967_v8 = vld [vmem:[#allocation7 + $0x20] sm:$0xff]   ;;  %v1968_v9 = vld [vmem:[#allocation7 + $0x28] sm:$0xff]   ;;  %v2556_v34 = vshrl.u32 %v208_v33, 7 }
  0x73   :  { %1900 = vmatpush3.bf16.msra.mxu0 %v1962_v1  ;;  %1906 = vmatpush3.bf16.msra.mxu1 %v1963_v4  ;;  %v1969_v10 = vld [vmem:[#allocation7 + $0x30] sm:$0xff]   ;;  %v1970_v11 = vld [vmem:[#allocation7 + $0x38] sm:$0xff]   ;;  %v1971_v45 = vld [vmem:[#allocation8] sm:$0xff]  }
  0x74   :  { %1925 = vmatprep.subr.bf16.mxu0 %v2377_v0  ;;  %1907 = vmatprep.subr.bf16.mxu1 %v2377_v0  ;;  %v203_v35 = vld [vmem:[%s2633_s2] sm:$0x1]  ;;  %v2562_v36 = vsub.s32 0, %v2556_v34  ;;  %v1972_v46 = vld [vmem:[#allocation8 + $0x8] sm:$0xff]   ;;  %v1974_v48 = vld [vmem:[#allocation8 + $0x18] sm:$0xff]  }
  0x75   :  { %v1703_v40 = vld [vmem:[%s2634_s3] ss:$0 sm:$0xff]  ;;  %v1975_v49 = vld [vmem:[#allocation8 + $0x20] sm:$0xff]   ;;  %v1976_v50 = vld [vmem:[#allocation8 + $0x28] sm:$0xff]  }
  0x76   :  { %1902 = vmatmul.mubr.msk.bf16.vlgmr.msra.gmra.mrb[0].mxu0 %vm142_vm1, %v133_v3  ;;  %v1973_v47 = vld [vmem:[#allocation8 + $0x10] sm:$0xff]   ;;  %v1978_v52 = vld [vmem:[#allocation8 + $0x38] sm:$0xff]  }
  0x77   :  { %1941 = vmatprep.mubr.msk.bf16.mxu0 %vm2378_vm0, %v2377_v0  ;;  %1908 = vmatpush3.bf16.msra.mxu1 %v1964_v5  ;;  %v1977_v51 = vld [vmem:[#allocation8 + $0x30] sm:$0xff]  }
  0x78   :  { %1909 = vmatprep.subr.bf16.mxu1 %v2377_v0  ;;  %1926 = vmatpush3.bf16.msra.mxu0 %v1971_v45  ;;  %v2000_v33 = vld [vmem:[#allocation10 + $0x70] ss:$8 sps:$4 sm:$0xff]  }
  0x79   :  { %1927 = vmatprep.subr.bf16.mxu0 %v2377_v0 }
  0x7b   :  { %1910 = vmatpush3.bf16.msra.mxu1 %v1965_v6 }
  0x7c   :  { %1911 = vmatprep.subr.bf16.mxu1 %v2377_v0  ;;  %1928 = vmatpush3.bf16.msra.mxu0 %v1972_v46 }
  0x7d   :  { %1929 = vmatprep.subr.bf16.mxu0 %v2377_v0 }
  0x7f   :  { %1912 = vmatpush3.bf16.msra.mxu1 %v1966_v7 }
  0x80   :  { %1913 = vmatprep.subr.bf16.mxu1 %v2377_v0  ;;  %1930 = vmatpush3.bf16.msra.mxu0 %v1973_v47 }
  0x81   :  { %1931 = vmatprep.subr.bf16.mxu0 %v2377_v0 }
  0x83   :  { %1914 = vmatpush3.bf16.msra.mxu1 %v1967_v8 }
  0x84   :  { %1915 = vmatprep.subr.bf16.mxu1 %v2377_v0  ;;  %1932 = vmatpush3.bf16.msra.mxu0 %v1974_v48 }
  0x85   :  { %1933 = vmatprep.subr.bf16.mxu0 %v2377_v0 }
  0x87   :  { %1916 = vmatpush3.bf16.msra.mxu1 %v1968_v9 }
  0x88   :  { %1917 = vmatprep.subr.bf16.mxu1 %v2377_v0  ;;  %1934 = vmatpush3.bf16.msra.mxu0 %v1975_v49 }
  0x89   :  { %1935 = vmatprep.subr.bf16.mxu0 %v2377_v0 }
  0x8b   :  { %1918 = vmatpush3.bf16.msra.mxu1 %v1969_v10  ;;  %v344_v10 = vld [vmem:[%s2636_s5] sm:$0x1] }
  0x8c   :  { %1919 = vmatprep.subr.bf16.mxu1 %v2377_v0  ;;  %1936 = vmatpush3.bf16.msra.mxu0 %v1976_v50 }
  0x8d   :  { %1937 = vmatprep.subr.bf16.mxu0 %v2377_v0 }
  0x8f   :  { %1920 = vmatpush3.bf16.msra.mxu1 %v1970_v11 }
  0x90   :  { %1938 = vmatpush3.bf16.msra.mxu0 %v1977_v51 }
  0x91   :  { %1939 = vmatprep.subr.bf16.mxu0 %v2377_v0 }
  0x94   :  { %1940 = vmatpush3.bf16.msra.mxu0 %v1978_v52 }
 0x149   :  { %v180_v12 = vpop.f32.mrb[0].mxu0 }
 0x14a   :  { %v186_v13 = vrot.slane %v180_v12, 4  ;;  %v1903_v14 = vpop.f32.mrb[1].mxu0 }
 0x14b   :  { %v183_v15 = vpop.f32.mrb[2].mxu0  ;;  %v1712_v14 = vld [vmem:[%s2637_s6] ss:$0 sm:$0xff] }
 0x14c   :  { %v187_v16 = vadd.f32 %v186_v13, %v180_v12  ;;  %v1904_v17 = vpop.f32.mrb[3].mxu0 }
 0x14e   :  { %v188_v18 = vrot.slane %v187_v16, 2 }
 0x150   :  { %v189_v19 = vadd.f32 %v188_v18, %v187_v16 }
 0x152   :  { %v190_v20 = vrot.slane %v189_v19, 1 }
 0x154   :  { %v191_v21 = vadd.f32 %v190_v20, %v189_v19  ;;  %v1981_v19 = vld [vmem:[#allocation10 + $0x4] ss:$8 sps:$4 sm:$0xff]   ;;  %v1979_v20 = vld [vmem:[#allocation10] ss:$8 sps:$4 sm:$0xff]  }
 0x155   :  { %602 = vmatprep.subr.bf16.mxu1 %v1981_v19  ;;  %v2024_v19 = vld [vmem:[#allocation11 + $0xb0] ss:$28 sps:$4 sm:$0xff]  }
 0x156   :  { %v193_v22 = vmul.f32 0.125, %v191_v21  ;;  %v1984_v21 = vld [vmem:[#allocation10 + $0x14] ss:$8 sps:$4 sm:$0xff]  }
 0x158   :  { %v194_v23 = vsub.f32 %v180_v12, %v193_v22  ;;  %v1982_v22 = vld [vmem:[#allocation10 + $0x10] ss:$8 sps:$4 sm:$0xff]  }
 0x15a   :  { %v195_v24 = vmul.f32 %v194_v23, %v194_v23 }
 0x15c   :  { %v196_v25 = vrot.slane %v195_v24, 4 }
 0x15e   :  { %v197_v26 = vadd.f32 %v196_v25, %v195_v24  ;;  %v1985_v24 = vld [vmem:[#allocation10 + $0x20] ss:$8 sps:$4 sm:$0xff]   ;;  %v1990_v25 = vld [vmem:[#allocation10 + $0x34] ss:$8 sps:$4 sm:$0xff]  }
 0x160   :  { %v198_v27 = vrot.slane %v197_v26, 2 }
 0x162   :  { %v199_v28 = vadd.f32 %v198_v27, %v197_v26  ;;  %v1988_v26 = vld [vmem:[#allocation10 + $0x30] ss:$8 sps:$4 sm:$0xff]   ;;  %v1993_v27 = vld [vmem:[#allocation10 + $0x44] ss:$8 sps:$4 sm:$0xff]  }
 0x164   :  { %v200_v29 = vrot.slane %v199_v28, 1 }
 0x166   :  { %v201_v30 = vadd.f32 %v200_v29, %v199_v28  ;;  %v1991_v28 = vld [vmem:[#allocation10 + $0x40] ss:$8 sps:$4 sm:$0xff]   ;;  %v1996_v29 = vld [vmem:[#allocation10 + $0x54] ss:$8 sps:$4 sm:$0xff]  }
 0x168   :  { %v202_v31 = vmul.f32 0.125, %v201_v30  ;;  %v1994_v30 = vld [vmem:[#allocation10 + $0x50] ss:$8 sps:$4 sm:$0xff]  }
 0x16a   :  { %v204_v32 = vadd.f32 1e-05, %v202_v31  ;;  %v1999_v31 = vld [vmem:[#allocation10 + $0x64] ss:$8 sps:$4 sm:$0xff]  }
 0x16c   :  { %2163 = vrsqrt.f32 %v204_v32  ;;  %v1997_v32 = vld [vmem:[#allocation10 + $0x60] ss:$8 sps:$4 sm:$0xff]  }
 0x176   :  { %v2164_v37 = vpop.eup %2163 }
 0x177   :  { %v206_v38 = vmul.f32 %v2164_v37, %v203_v35  ;;  %v2002_v35 = vld [vmem:[#allocation10 + $0x74] ss:$8 sps:$4 sm:$0xff]   ;;  %v2379_v37 = vmov 0  }
 0x179   :  { %v211_v39 = vrot.slane %v206_v38, %v2562_v36 }
 0x17b   :  { %v213_v41 = vmul.f32 %v211_v39, %v194_v23  ;;  %v1987_v23 = vld [vmem:[#allocation10 + $0x24] ss:$8 sps:$4 sm:$0xff]  }
 0x17d   :  { %v221_v42 = vadd.f32 %v1703_v40, %v213_v41 }
 0x17f   :  { %v222_v43 = vmax.f32 %v221_v42, 0.0 }
 0x181   :  { %v223_v44 = vpack.c.bf16 %v222_v43, %v222_v43 }
 0x183   :  { %1922 = vmatmul.mubr.bf16.vlgmr.msra.gmra.mrb[0].mxu1 %v223_v44 }
 0x184   :  { %603 = vmatpush1.bf16.msra.mxu1 %v1979_v20  ;;  %634 = vmatprep.mubr.bf16.mxu1 %v2379_v37  ;;  %v2029_v20 = vld [vmem:[#allocation11 + $0xe4] ss:$28 sps:$4 sm:$0xff]   ;;  %v2048_v37 = vld [vmem:[#allocation11 + $0x190] ss:$28 sps:$4 sm:$0xff]  }
 0x185   :  { %604 = vmatprep.subr.bf16.mxu1 %v1984_v21  ;;  %v2032_v21 = vld [vmem:[#allocation11 + $0xec] ss:$28 sps:$4 sm:$0xff]  }
 0x188   :  { %605 = vmatpush1.bf16.msra.mxu1 %v1982_v22  ;;  %v2027_v22 = vld [vmem:[#allocation11 + $0xe0] ss:$28 sps:$4 sm:$0xff]  }
 0x189   :  { %606 = vmatprep.subr.bf16.mxu1 %v1987_v23  ;;  %v2030_v23 = vld [vmem:[#allocation11 + $0xe8] ss:$28 sps:$4 sm:$0xff]  }
 0x18c   :  { %607 = vmatpush1.bf16.msra.mxu1 %v1985_v24  ;;  %v2035_v24 = vld [vmem:[#allocation11 + $0x11c] ss:$28 sps:$4 sm:$0xff]  }
 0x18d   :  { %608 = vmatprep.subr.bf16.mxu1 %v1990_v25  ;;  %v2038_v25 = vld [vmem:[#allocation11 + $0x124] ss:$28 sps:$4 sm:$0xff]  }
 0x190   :  { %609 = vmatpush1.bf16.msra.mxu1 %v1988_v26  ;;  %v2033_v26 = vld [vmem:[#allocation11 + $0x118] ss:$28 sps:$4 sm:$0xff]  }
 0x191   :  { %610 = vmatprep.subr.bf16.mxu1 %v1993_v27  ;;  %v2036_v27 = vld [vmem:[#allocation11 + $0x120] ss:$28 sps:$4 sm:$0xff]  }
 0x194   :  { %611 = vmatpush1.bf16.msra.mxu1 %v1991_v28  ;;  %v2041_v28 = vld [vmem:[#allocation11 + $0x154] ss:$28 sps:$4 sm:$0xff]  }
 0x195   :  { %612 = vmatprep.subr.bf16.mxu1 %v1996_v29  ;;  %v2044_v29 = vld [vmem:[#allocation11 + $0x15c] ss:$28 sps:$4 sm:$0xff]  }
 0x198   :  { %613 = vmatpush1.bf16.msra.mxu1 %v1994_v30  ;;  %v2039_v30 = vld [vmem:[#allocation11 + $0x150] ss:$28 sps:$4 sm:$0xff]  }
 0x199   :  { %614 = vmatprep.subr.bf16.mxu1 %v1999_v31  ;;  %v2042_v31 = vld [vmem:[#allocation11 + $0x158] ss:$28 sps:$4 sm:$0xff]  }
 0x19c   :  { %615 = vmatpush1.bf16.msra.mxu1 %v1997_v32  ;;  %v2047_v32 = vld [vmem:[#allocation11 + $0x18c] ss:$28 sps:$4 sm:$0xff]  }
 0x19d   :  { %616 = vmatprep.subr.bf16.mxu1 %v2002_v35  ;;  %v2045_v35 = vld [vmem:[#allocation11 + $0x188] ss:$28 sps:$4 sm:$0xff]  }
 0x1a0   :  { %617 = vmatpush1.bf16.msra.mxu1 %v2000_v33  ;;  %v2050_v33 = vld [vmem:[#allocation11 + $0x194] ss:$28 sps:$4 sm:$0xff]  }
 0x256   :  { %v322_v53 = vpop.f32.mrb[0].mxu1 }
 0x257   :  { %v328_v54 = vrot.slane %v322_v53, 4  ;;  %v1923_v55 = vpop.f32.mrb[1].mxu1 }
 0x258   :  { %v325_v56 = vpop.f32.mrb[2].mxu1 }
 0x259   :  { %v329_v57 = vadd.f32 %v328_v54, %v322_v53  ;;  %v1924_v58 = vpop.f32.mrb[3].mxu1 }
 0x25b   :  { %v330_v59 = vrot.slane %v329_v57, 2 }
 0x25d   :  { %v331_v60 = vadd.f32 %v330_v59, %v329_v57  ;;  %v485_v59 = vld [vmem:[%s2639_s8] sm:$0x1] }
 0x25f   :  { %v332_v61 = vrot.slane %v331_v60, 1 }
 0x261   :  { %v333_v62 = vadd.f32 %v332_v61, %v331_v60 }
 0x263   :  { %v334_v63 = vmul.f32 0.125, %v333_v62 }
 0x265   :  { %v335_v1 = vsub.f32 %v322_v53, %v334_v63  ;;  %v1721_v63 = vld [vmem:[%s2640_s9] ss:$0 sm:$0xff] }
 0x267   :  { %v336_v2 = vmul.f32 %v335_v1, %v335_v1 }
 0x269   :  { %v337_v3 = vrot.slane %v336_v2, 4 }
 0x26b   :  { %v338_v4 = vadd.f32 %v337_v3, %v336_v2 }
 0x26d   :  { %v339_v5 = vrot.slane %v338_v4, 2 }
 0x26f   :  { %v340_v6 = vadd.f32 %v339_v5, %v338_v4  ;;  %v2005_v5 = vld [vmem:[#allocation11 + $0x4] ss:$28 sps:$4 sm:$0xff]  }
 0x270   :  { %1471 = vmatprep.subr.bf16.mxu0 %v2005_v5  ;;  %v2096_v5 = vld [vmem:[#allocation11 + $0x350] ss:$28 sps:$4 sm:$0xff]  }
 0x271   :  { %v341_v0 = vrot.slane %v340_v6, 1 }
 0x273   :  { %v342_v7 = vadd.f32 %v341_v0, %v340_v6  ;;  %v2008_v6 = vld [vmem:[#allocation11 + $0xc] ss:$28 sps:$4 sm:$0xff]   ;;  %v2003_v0 = vld [vmem:[#allocation11] ss:$28 sps:$4 sm:$0xff]  }
 0x274   :  { %1512 = vmatprep.subr.bf16.mxu1 %v2008_v6  ;;  %v2098_v6 = vld [vmem:[#allocation11 + $0x354] ss:$28 sps:$4 sm:$0xff]  }
 0x275   :  { %v343_v8 = vmul.f32 0.125, %v342_v7  ;;  %v2006_v7 = vld [vmem:[#allocation11 + $0x8] ss:$28 sps:$4 sm:$0xff]  }
 0x277   :  { %v345_v9 = vadd.f32 1e-05, %v343_v8  ;;  %v2011_v8 = vld [vmem:[#allocation11 + $0x3c] ss:$28 sps:$4 sm:$0xff]  }
 0x279   :  { %2165 = vrsqrt.f32 %v345_v9  ;;  %v2014_v9 = vld [vmem:[#allocation11 + $0x44] ss:$28 sps:$4 sm:$0xff]  }
 0x283   :  { %v2166_v11 = vpop.eup %2165 }
 0x284   :  { %v347_v12 = vmul.f32 %v2166_v11, %v344_v10  ;;  %v2009_v10 = vld [vmem:[#allocation11 + $0x38] ss:$28 sps:$4 sm:$0xff]   ;;  %v2012_v11 = vld [vmem:[#allocation11 + $0x40] ss:$28 sps:$4 sm:$0xff]  }
 0x286   :  { %v352_v13 = vrot.slane %v347_v12, %v2562_v36  ;;  %v2017_v12 = vld [vmem:[#allocation11 + $0x74] ss:$28 sps:$4 sm:$0xff]  }
 0x288   :  { %v354_v15 = vmul.f32 %v352_v13, %v335_v1  ;;  %v2020_v13 = vld [vmem:[#allocation11 + $0x7c] ss:$28 sps:$4 sm:$0xff]  }
 0x28a   :  { %v362_v16 = vadd.f32 %v1712_v14, %v354_v15  ;;  %v2015_v14 = vld [vmem:[#allocation11 + $0x70] ss:$28 sps:$4 sm:$0xff]   ;;  %v2018_v15 = vld [vmem:[#allocation11 + $0x78] ss:$28 sps:$4 sm:$0xff]  }
 0x28c   :  { %v363_v17 = vmax.f32 %v362_v16, 0.0  ;;  %v2023_v16 = vld [vmem:[#allocation11 + $0xac] ss:$28 sps:$4 sm:$0xff]  }
 0x28e   :  { %v364_v18 = vpack.c.bf16 %v363_v17, %v363_v17  ;;  %v2026_v17 = vld [vmem:[#allocation11 + $0xb4] ss:$28 sps:$4 sm:$0xff]  }
 0x290   :  { %1942 = vmatmul.mubr.bf16.vlgmr.msra.gmra.mrb[4].mxu0 %v364_v18  ;;  %v2021_v18 = vld [vmem:[#allocation11 + $0xa8] ss:$28 sps:$4 sm:$0xff]  }
 0x291   :  { %1472 = vmatpush1.bf16.msra.mxu0 %v2003_v0  ;;  %v2101_v0 = vld [vmem:[#allocation11 + $0x14] ss:$28 sps:$4 sm:$0xff]  }
 0x292   :  { %1473 = vmatprep.subr.bf16.mxu0 %v2011_v8 }
 0x295   :  { %1474 = vmatpush1.bf16.msra.mxu0 %v2009_v10 }
 0x296   :  { %1475 = vmatprep.subr.bf16.mxu0 %v2017_v12 }
 0x299   :  { %1476 = vmatpush1.bf16.msra.mxu0 %v2015_v14 }
 0x29a   :  { %1477 = vmatprep.subr.bf16.mxu0 %v2023_v16 }
 0x29d   :  { %1478 = vmatpush1.bf16.msra.mxu0 %v2021_v18 }
 0x29e   :  { %1479 = vmatprep.subr.bf16.mxu0 %v2029_v20 }
 0x2a1   :  { %1480 = vmatpush1.bf16.msra.mxu0 %v2027_v22 }
 0x2a2   :  { %1481 = vmatprep.subr.bf16.mxu0 %v2035_v24 }
 0x2a5   :  { %1482 = vmatpush1.bf16.msra.mxu0 %v2033_v26 }
 0x2a6   :  { %1483 = vmatprep.subr.bf16.mxu0 %v2041_v28 }
 0x2a9   :  { %1484 = vmatpush1.bf16.msra.mxu0 %v2039_v30 }
 0x2aa   :  { %1485 = vmatprep.subr.bf16.mxu0 %v2047_v32 }
 0x2ad   :  { %1486 = vmatpush1.bf16.msra.mxu0 %v2045_v35 }
 0x363   :  { %v463_v38 = vpop.f32.mrb[4].mxu0 }
 0x364   :  { %v469_v39 = vrot.slane %v463_v38, 4  ;;  %v1943_v40 = vpop.f32.mrb[5].mxu0 }
 0x365   :  { %v466_v41 = vpop.f32.mrb[6].mxu0  ;;  %v2051_v40 = vld [vmem:[#allocation11 + $0x1c0] ss:$28 sps:$4 sm:$0xff]  }
 0x366   :  { %v470_v42 = vadd.f32 %v469_v39, %v463_v38  ;;  %v1944_v43 = vpop.f32.mrb[7].mxu0  ;;  %v2056_v39 = vld [vmem:[#allocation11 + $0x1cc] ss:$28 sps:$4 sm:$0xff]  }
 0x367   :  { %v2054_v41 = vld [vmem:[#allocation11 + $0x1c8] ss:$28 sps:$4 sm:$0xff]  }
 0x368   :  { %v471_v44 = vrot.slane %v470_v42, 2  ;;  %v2062_v43 = vld [vmem:[#allocation11 + $0x204] ss:$28 sps:$4 sm:$0xff]  }
 0x36a   :  { %v472_v45 = vadd.f32 %v471_v44, %v470_v42  ;;  %v2059_v42 = vld [vmem:[#allocation11 + $0x1fc] ss:$28 sps:$4 sm:$0xff]  }
 0x36b   :  { %v2057_v44 = vld [vmem:[#allocation11 + $0x1f8] ss:$28 sps:$4 sm:$0xff]  }
 0x36c   :  { %v473_v46 = vrot.slane %v472_v45, 1 }
 0x36e   :  { %v474_v47 = vadd.f32 %v473_v46, %v472_v45  ;;  %v2060_v45 = vld [vmem:[#allocation11 + $0x200] ss:$28 sps:$4 sm:$0xff]   ;;  %v2065_v46 = vld [vmem:[#allocation11 + $0x234] ss:$28 sps:$4 sm:$0xff]  }
 0x370   :  { %v475_v48 = vmul.f32 0.125, %v474_v47  ;;  %v2068_v47 = vld [vmem:[#allocation11 + $0x23c] ss:$28 sps:$4 sm:$0xff]  }
 0x372   :  { %v476_v49 = vsub.f32 %v463_v38, %v475_v48  ;;  %v2053_v38 = vld [vmem:[#allocation11 + $0x1c4] ss:$28 sps:$4 sm:$0xff]   ;;  %v2063_v48 = vld [vmem:[#allocation11 + $0x230] ss:$28 sps:$4 sm:$0xff]  }
 0x373   :  { %1487 = vmatprep.subr.bf16.mxu0 %v2053_v38 }
 0x374   :  { %v477_v50 = vmul.f32 %v476_v49, %v476_v49  ;;  %1488 = vmatpush1.bf16.msra.mxu0 %v2051_v40 }
 0x375   :  { %1489 = vmatprep.subr.bf16.mxu0 %v2059_v42 }
 0x376   :  { %v478_v51 = vrot.slane %v477_v50, 4 }
 0x378   :  { %v479_v52 = vadd.f32 %v478_v51, %v477_v50  ;;  %1490 = vmatpush1.bf16.msra.mxu0 %v2057_v44  ;;  %v2071_v50 = vld [vmem:[#allocation11 + $0x26c] ss:$28 sps:$4 sm:$0xff]   ;;  %v2074_v51 = vld [vmem:[#allocation11 + $0x274] ss:$28 sps:$4 sm:$0xff]  }
 0x379   :  { %1491 = vmatprep.subr.bf16.mxu0 %v2065_v46 }
 0x37a   :  { %v480_v53 = vrot.slane %v479_v52, 2 }
 0x37c   :  { %v481_v54 = vadd.f32 %v480_v53, %v479_v52  ;;  %1492 = vmatpush1.bf16.msra.mxu0 %v2063_v48  ;;  %v2069_v52 = vld [vmem:[#allocation11 + $0x268] ss:$28 sps:$4 sm:$0xff]   ;;  %v2072_v53 = vld [vmem:[#allocation11 + $0x270] ss:$28 sps:$4 sm:$0xff]   ;;  %v2380_v48 = vmov 1966171168  }
 0x37d   :  { %1493 = vmatprep.subr.bf16.mxu0 %v2071_v50 }
 0x37e   :  { %v482_v55 = vrot.slane %v481_v54, 1 }
 0x380   :  { %v483_v56 = vadd.f32 %v482_v55, %v481_v54  ;;  %1494 = vmatpush1.bf16.msra.mxu0 %v2069_v52  ;;  %v2077_v54 = vld [vmem:[#allocation11 + $0x2a4] ss:$28 sps:$4 sm:$0xff]   ;;  %v2080_v55 = vld [vmem:[#allocation11 + $0x2ac] ss:$28 sps:$4 sm:$0xff]  }
 0x381   :  { %1495 = vmatprep.subr.bf16.mxu0 %v2077_v54 }
 0x382   :  { %v484_v57 = vmul.f32 0.125, %v483_v56  ;;  %v2075_v56 = vld [vmem:[#allocation11 + $0x2a0] ss:$28 sps:$4 sm:$0xff]  }
 0x384   :  { %v486_v58 = vadd.f32 1e-05, %v484_v57  ;;  %v2078_v57 = vld [vmem:[#allocation11 + $0x2a8] ss:$28 sps:$4 sm:$0xff]   ;;  %1496 = vmatpush1.bf16.msra.mxu0 %v2075_v56  ;;  %v675_v56 = vld [vmem:[%s2642_s11] sm:$0x3] }
 0x386   :  { %2167 = vrsqrt.f32 %v486_v58  ;;  %v2083_v58 = vld [vmem:[#allocation11 + $0x2dc] ss:$28 sps:$4 sm:$0xff]  }
 0x387   :  { %1497 = vmatprep.subr.bf16.mxu0 %v2083_v58  ;;  %v2594_v58 = vsub.s32 1, %v2556_v34 }
 0x390   :  { %v2168_v60 = vpop.eup %2167 }
 0x391   :  { %v488_v61 = vmul.f32 %v2168_v60, %v485_v59  ;;  %v2086_v59 = vld [vmem:[#allocation11 + $0x2e4] ss:$28 sps:$4 sm:$0xff]   ;;  %v2081_v60 = vld [vmem:[#allocation11 + $0x2d8] ss:$28 sps:$4 sm:$0xff]  }
 0x392   :  { %1498 = vmatpush1.bf16.msra.mxu0 %v2081_v60 }
 0x393   :  { %v493_v62 = vrot.slane %v488_v61, %v2562_v36  ;;  %v2084_v61 = vld [vmem:[#allocation11 + $0x2e0] ss:$28 sps:$4 sm:$0xff]  }
 0x395   :  { %v495_v1 = vmul.f32 %v493_v62, %v476_v49  ;;  %v2066_v49 = vld [vmem:[#allocation11 + $0x238] ss:$28 sps:$4 sm:$0xff]  }
 0x396   :  { %v2089_v62 = vld [vmem:[#allocation11 + $0x314] ss:$28 sps:$4 sm:$0xff]  }
 0x397   :  { %v503_v2 = vadd.f32 %v1721_v63, %v495_v1  ;;  %v2092_v63 = vld [vmem:[#allocation11 + $0x31c] ss:$28 sps:$4 sm:$0xff]   ;;  %v2087_v1 = vld [vmem:[#allocation11 + $0x310] ss:$28 sps:$4 sm:$0xff]   ;;  %1499 = vmatprep.subr.bf16.mxu0 %v2089_v62 }
 0x398   :  { %1500 = vmatpush1.bf16.msra.mxu0 %v2087_v1 }
 0x399   :  { %v504_v3 = vmax.f32 %v503_v2, 0.0  ;;  %v2090_v2 = vld [vmem:[#allocation11 + $0x318] ss:$28 sps:$4 sm:$0xff]  }
 0x39b   :  { %v505_v4 = vpack.c.bf16 %v504_v3, %v504_v3  ;;  %v2093_v3 = vld [vmem:[#allocation11 + $0x348] ss:$28 sps:$4 sm:$0xff]  }
 0x39d   :  { %635 = vmatmul.mubr.bf16.vlgmr.msra.gmra.mrb[4].mxu1 %v505_v4  ;;  %v2095_v4 = vld [vmem:[#allocation11 + $0x34c] ss:$28 sps:$4 sm:$0xff]  }
 0x39e   :  { %1513 = vmatpush1.bf16.msra.mxu1 %v2006_v7  ;;  %1501 = vmatprep.subr.bf16.mxu0 %v2095_v4  ;;  %v2102_v7 = vld [vmem:[#allocation11 + $0x1d8] ss:$28 sps:$4 sm:$0xff]  }
 0x39f   :  { %1514 = vmatprep.subr.bf16.mxu1 %v2014_v9  ;;  %1502 = vmatpush1.bf16.msra.mxu0 %v2093_v3 }
 0x3a0   :  { %1553 = vmatprep.subr.bf16.mxu0 %v2101_v0 }
 0x3a2   :  { %1515 = vmatpush1.bf16.msra.mxu1 %v2012_v11 }
 0x3a3   :  { %1516 = vmatprep.subr.bf16.mxu1 %v2020_v13 }
 0x3a6   :  { %1517 = vmatpush1.bf16.msra.mxu1 %v2018_v15 }
 0x3a7   :  { %1518 = vmatprep.subr.bf16.mxu1 %v2026_v17 }
 0x3aa   :  { %1519 = vmatpush1.bf16.msra.mxu1 %v2024_v19 }
 0x3ab   :  { %1520 = vmatprep.subr.bf16.mxu1 %v2032_v21 }
 0x3ae   :  { %1521 = vmatpush1.bf16.msra.mxu1 %v2030_v23 }
 0x3af   :  { %1522 = vmatprep.subr.bf16.mxu1 %v2038_v25 }
 0x3b2   :  { %1523 = vmatpush1.bf16.msra.mxu1 %v2036_v27 }
 0x3b3   :  { %1524 = vmatprep.subr.bf16.mxu1 %v2044_v29 }
 0x3b6   :  { %1525 = vmatpush1.bf16.msra.mxu1 %v2042_v31 }
 0x3b7   :  { %1526 = vmatprep.subr.bf16.mxu1 %v2050_v33 }
 0x3ba   :  { %1527 = vmatpush1.bf16.msra.mxu1 %v2048_v37 }
 0x3bb   :  { %1528 = vmatprep.subr.bf16.mxu1 %v2056_v39 }
 0x3be   :  { %1529 = vmatpush1.bf16.msra.mxu1 %v2054_v41 }
 0x3bf   :  { %1530 = vmatprep.subr.bf16.mxu1 %v2062_v43 }
 0x3c2   :  { %1531 = vmatpush1.bf16.msra.mxu1 %v2060_v45 }
 0x3c3   :  { %1532 = vmatprep.subr.bf16.mxu1 %v2068_v47 }
 0x3c6   :  { %1533 = vmatpush1.bf16.msra.mxu1 %v2066_v49  ;;  %v684_v49 = vunpack.c.l.s4 %v2380_v48  ;;  %v2148_v48 = vld [vmem:[#allocation11 + $0x278] ss:$28 sps:$4 sm:$0xff]  }
 0x3c7   :  { %1534 = vmatprep.subr.bf16.mxu1 %v2074_v51 }
 0x3c8   :  { %v685_v50 = vunpack.c.0.s8 %v684_v49  ;;  %v2153_v49 = vld [vmem:[#allocation11 + $0x2b4] ss:$28 sps:$4 sm:$0xff]  }
 0x3ca   :  { %1535 = vmatpush1.bf16.msra.mxu1 %v2072_v53  ;;  %v688_v52 = vsub.s32 %v685_v50, %v2556_v34  ;;  %v2151_v50 = vld [vmem:[#allocation11 + $0x2b0] ss:$28 sps:$4 sm:$0xff]  }
 0x3cb   :  { %1536 = vmatprep.subr.bf16.mxu1 %v2080_v55 }
 0x3ce   :  { %1537 = vmatpush1.bf16.msra.mxu1 %v2078_v57 }
 0x3cf   :  { %1538 = vmatprep.subr.bf16.mxu1 %v2086_v59  ;;  %v712_v59 = vld [vmem:[%s2643_s12] sm:$0x3] }
 0x3d0   :  { %v717_v1 = vrot.slane %v712_v59, %v2562_v36 }
 0x3d2   :  { %1539 = vmatpush1.bf16.msra.mxu1 %v2084_v61 }
 0x3d3   :  { %1540 = vmatprep.subr.bf16.mxu1 %v2092_v63  ;;  %v721_v63 = vrot.slane %v712_v59, %v2594_v58  ;;  %v858_v59 = vld [vmem:[%s2645_s14] sm:$0xff]  ;;  %s2381_s14 = smov [#allocation13]  }
 0x3d4   :  { %s1689_s22 = sshll.u32 %s2381_s14, 4  ;;  %s1690_s22 = int_to_ptr.vmem [resolvable:$true] %s1689_s22 }
 0x3d5   :  { %s2333_s23 = scalar_lea.vmem %s1690_s22, 896  ;;  %p2338_p7 = scmp.lt.s32.totalorder %s1690_s22, %s1690_s22 }
 0x3d6   :  { %1541 = vmatpush1.bf16.msra.mxu1 %v2090_v2  ;;  %p2334_p6 = scmp.ne.s32.totalorder %s1690_s22, %s2333_s23  ;;  %p2339_p8 = scmp.lt.s32.totalorder %s2333_s23, %s2333_s23 }
 0x3d7   :  { %1542 = vmatprep.subr.bf16.mxu1 %v2098_v6 }
 0x3d8   :  { %p2340_p9 = por %p2339_p8, %p2338_p7 }
 0x3da   :  { %1543 = vmatpush1.bf16.msra.mxu1 %v2096_v5  ;;  %p2341_p10 = pnand %p2340_p9, %p2334_p6 }
 0x3db   :  { %1877 = vmatprep.subr.bf16.mxu1 %v2102_v7 }
 0x470   :  { %v636_v8 = vpop.f32.mrb[4].mxu1 }
 0x471   :  { %v643_v9 = vrot.slane %v636_v8, 4  ;;  %v638_v10 = vpop.f32.mrb[5].mxu1 }
 0x472   :  { %v649_v11 = vrot.slane %v638_v10, 4  ;;  %v640_v12 = vpop.f32.mrb[6].mxu1 }
 0x473   :  { %v644_v13 = vadd.f32 %v643_v9, %v636_v8  ;;  %v641_v14 = vpop.f32.mrb[7].mxu1  ;;  %v2107_v12 = vld [vmem:[#allocation11 + $0x210] ss:$28 sps:$4 sm:$0xff]  }
 0x474   :  { %v650_v15 = vadd.f32 %v649_v11, %v638_v10  ;;  %v2106_v11 = vld [vmem:[#allocation11 + $0x4c] ss:$28 sps:$4 sm:$0xff]  }
 0x475   :  { %v645_v16 = vrot.slane %v644_v13, 2  ;;  %v2108_v14 = vld [vmem:[#allocation11 + $0x50] ss:$28 sps:$4 sm:$0xff]  }
 0x476   :  { %v651_v17 = vrot.slane %v650_v15, 2 }
 0x477   :  { %v646_v18 = vadd.f32 %v645_v16, %v644_v13  ;;  %v2104_v13 = vld [vmem:[#allocation11 + $0x48] ss:$28 sps:$4 sm:$0xff]  }
 0x478   :  { %v652_v19 = vadd.f32 %v651_v17, %v650_v15  ;;  %v2111_v15 = vld [vmem:[#allocation11 + $0x84] ss:$28 sps:$4 sm:$0xff]  }
 0x479   :  { %v647_v20 = vrot.slane %v646_v18, 1  ;;  %v2112_v16 = vld [vmem:[#allocation11 + $0x248] ss:$28 sps:$4 sm:$0xff]   ;;  %v2109_v17 = vld [vmem:[#allocation11 + $0x80] ss:$28 sps:$4 sm:$0xff]  }
 0x47a   :  { %v653_v21 = vrot.slane %v652_v19, 1 }
 0x47b   :  { %v648_v22 = vadd.f32 %v647_v20, %v646_v18  ;;  %v2113_v18 = vld [vmem:[#allocation11 + $0x88] ss:$28 sps:$4 sm:$0xff]   ;;  %v2117_v20 = vld [vmem:[#allocation11 + $0x280] ss:$28 sps:$4 sm:$0xff]  }
 0x47c   :  { %v654_v23 = vadd.f32 %v653_v21, %v652_v19  ;;  %v2116_v19 = vld [vmem:[#allocation11 + $0xbc] ss:$28 sps:$4 sm:$0xff]  }
 0x47d   :  { %v655_v24 = vmul.f32 0.125, %v648_v22  ;;  %v2114_v21 = vld [vmem:[#allocation11 + $0xb8] ss:$28 sps:$4 sm:$0xff]   ;;  %v2118_v22 = vld [vmem:[#allocation11 + $0xc0] ss:$28 sps:$4 sm:$0xff]  }
 0x47e   :  { %v656_v25 = vmul.f32 0.125, %v654_v23  ;;  %v2121_v23 = vld [vmem:[#allocation11 + $0xf4] ss:$28 sps:$4 sm:$0xff]  }
 0x47f   :  { %v657_v26 = vsub.f32 %v636_v8, %v655_v24  ;;  %v2099_v8 = vld [vmem:[#allocation11 + $0x10] ss:$28 sps:$4 sm:$0xff]   ;;  %v2122_v24 = vld [vmem:[#allocation11 + $0x2b8] ss:$28 sps:$4 sm:$0xff]  }
 0x480   :  { %v658_v27 = vsub.f32 %v638_v10, %v656_v25  ;;  %v2103_v10 = vld [vmem:[#allocation11 + $0x18] ss:$28 sps:$4 sm:$0xff]   ;;  %v2119_v25 = vld [vmem:[#allocation11 + $0xf0] ss:$28 sps:$4 sm:$0xff]  }
 0x481   :  { %v659_v28 = vmul.f32 %v657_v26, %v657_v26 }
 0x482   :  { %v660_v29 = vmul.f32 %v658_v27, %v658_v27 }
 0x483   :  { %v661_v30 = vrot.slane %v659_v28, 4 }
 0x484   :  { %v667_v31 = vrot.slane %v660_v29, 4 }
 0x485   :  { %v662_v32 = vadd.f32 %v661_v30, %v659_v28  ;;  %v2127_v28 = vld [vmem:[#allocation11 + $0x2f0] ss:$28 sps:$4 sm:$0xff]  }
 0x486   :  { %v668_v33 = vadd.f32 %v667_v31, %v660_v29  ;;  %v2124_v29 = vld [vmem:[#allocation11 + $0x128] ss:$28 sps:$4 sm:$0xff]   ;;  %v2128_v30 = vld [vmem:[#allocation11 + $0x130] ss:$28 sps:$4 sm:$0xff]  }
 0x487   :  { %v663_v35 = vrot.slane %v662_v32, 2  ;;  %v2131_v31 = vld [vmem:[#allocation11 + $0x164] ss:$28 sps:$4 sm:$0xff]  }
 0x488   :  { %v669_v37 = vrot.slane %v668_v33, 2 }
 0x489   :  { %v664_v38 = vadd.f32 %v663_v35, %v662_v32  ;;  %v2132_v32 = vld [vmem:[#allocation11 + $0x328] ss:$28 sps:$4 sm:$0xff]  }
 0x48a   :  { %v670_v39 = vadd.f32 %v669_v37, %v668_v33  ;;  %v2129_v33 = vld [vmem:[#allocation11 + $0x160] ss:$28 sps:$4 sm:$0xff]   ;;  %v2133_v35 = vld [vmem:[#allocation11 + $0x168] ss:$28 sps:$4 sm:$0xff]  }
 0x48b   :  { %v665_v40 = vrot.slane %v664_v38, 1  ;;  %v2136_v37 = vld [vmem:[#allocation11 + $0x19c] ss:$28 sps:$4 sm:$0xff]  }
 0x48c   :  { %v671_v41 = vrot.slane %v670_v39, 1 }
 0x48d   :  { %v666_v42 = vadd.f32 %v665_v40, %v664_v38  ;;  %v2137_v38 = vld [vmem:[#allocation11 + $0x360] ss:$28 sps:$4 sm:$0xff]  }
 0x48e   :  { %v672_v43 = vadd.f32 %v671_v41, %v670_v39  ;;  %v2134_v39 = vld [vmem:[#allocation11 + $0x198] ss:$28 sps:$4 sm:$0xff]   ;;  %v2138_v40 = vld [vmem:[#allocation11 + $0x1a0] ss:$28 sps:$4 sm:$0xff]  }
 0x48f   :  { %v673_v44 = vmul.f32 0.125, %v666_v42  ;;  %v2141_v41 = vld [vmem:[#allocation11 + $0x1d4] ss:$28 sps:$4 sm:$0xff]  }
 0x490   :  { %v674_v45 = vmul.f32 0.125, %v672_v43  ;;  %v2139_v42 = vld [vmem:[#allocation11 + $0x1d0] ss:$28 sps:$4 sm:$0xff]  }
 0x491   :  { %v676_v46 = vadd.f32 1e-05, %v673_v44  ;;  %v2144_v43 = vld [vmem:[#allocation11 + $0x20c] ss:$28 sps:$4 sm:$0xff]  }
 0x492   :  { %v677_v47 = vadd.f32 1e-05, %v674_v45  ;;  %v2142_v44 = vld [vmem:[#allocation11 + $0x208] ss:$28 sps:$4 sm:$0xff]  }
 0x493   :  { %2169 = vrsqrt.f32 %v676_v46  ;;  %v2147_v45 = vld [vmem:[#allocation11 + $0x244] ss:$28 sps:$4 sm:$0xff]  }
 0x494   :  { %2171 = vrsqrt.f32 %v677_v47  ;;  %v2145_v46 = vld [vmem:[#allocation11 + $0x240] ss:$28 sps:$4 sm:$0xff]  }
 0x495   :  { %v2150_v47 = vld [vmem:[#allocation11 + $0x27c] ss:$28 sps:$4 sm:$0xff]  }
 0x49d   :  { %v2170_v51 = vpop.eup %2169 }
 0x49e   :  { %v2172_v53 = vpop.eup %2171 }
 0x49f   :  { %v682_v54 = vcombine.low %v2170_v51, %v2172_v53  ;;  %v2156_v51 = vld [vmem:[#allocation11 + $0x2ec] ss:$28 sps:$4 sm:$0xff]   ;;  %v2159_v53 = vld [vmem:[#allocation11 + $0x324] ss:$28 sps:$4 sm:$0xff]  }
 0x4a1   :  { %v689_v55 = vrot.slane %v682_v54, %v688_v52  ;;  %v2157_v54 = vld [vmem:[#allocation11 + $0x320] ss:$28 sps:$4 sm:$0xff]  }
 0x4a3   :  { %v696_v57 = vrot.slane %v689_v55, %v688_v52  ;;  %v2154_v52 = vld [vmem:[#allocation11 + $0x2e8] ss:$28 sps:$4 sm:$0xff]   ;;  %v2162_v55 = vld [vmem:[#allocation11 + $0x35c] ss:$28 sps:$4 sm:$0xff]  }
 0x4a5   :  { %v698_v60 = vmul.f32 %v696_v57, %v675_v56  ;;  %v2160_v56 = vld [vmem:[#allocation11 + $0x358] ss:$28 sps:$4 sm:$0xff]   ;;  %v870_v57 = vsub.s32 2, %v2556_v34 }
 0x4a7   :  { %v703_v61 = vrot.slane %v698_v60, %v2562_v36  ;;  %v707_v62 = vrot.slane %v698_v60, %v2594_v58  ;;  %v874_v60 = vsub.s32 3, %v2556_v34 }
 0x4a9   :  { %v711_v2 = vmul.f32 %v707_v62, %v658_v27  ;;  %v710_v3 = vmul.f32 %v703_v61, %v657_v26  ;;  %v2123_v26 = vld [vmem:[#allocation11 + $0xf8] ss:$28 sps:$4 sm:$0xff]   ;;  %v2126_v27 = vld [vmem:[#allocation11 + $0x12c] ss:$28 sps:$4 sm:$0xff]   ;;  %v863_v61 = vrot.slane %v858_v59, %v2562_v36  ;;  %v871_v62 = vrot.slane %v858_v59, %v870_v57 }
 0x4ab   :  { %v725_v4 = vadd.f32 %v721_v63, %v711_v2  ;;  %v724_v5 = vadd.f32 %v717_v1, %v710_v3  ;;  %v867_v63 = vrot.slane %v858_v59, %v2594_v58  ;;  %v875_v1 = vrot.slane %v858_v59, %v874_v60 }
 0x4ad   :  { %v727_v6 = vmax.f32 %v725_v4, 0.0  ;;  %v726_v0 = vmax.f32 %v724_v5, 0.0 }
 0x4af   :  { %v729_v7 = vpack.c.bf16 %v727_v6, %v727_v6  ;;  %v2603_v9 = vpack.c.bf16 %v726_v0, %v726_v0 }
 0x4b1   :  { %1503 = vmatprep.mubr.bf16.mxu0 %v729_v7  ;;  %1544 = vmatprep.mubr.bf16.mxu1 %v729_v7 }
 0x4b2   :  { %1504 = vmatmul.mubr.bf16.vlgmr.msra.gmra.mrb[8].mxu0 %v2603_v9  ;;  %1545 = vmatmul.mubr.bf16.vlgmr.msra.gmra.mrb[8].mxu1 %v2603_v9 }
 0x4b3   :  { %1554 = vmatpush1.bf16.msra.mxu0 %v2099_v8  ;;  %1878 = vmatpush3.bf16.msra.mxu1 %v2103_v10 }
 0x4b4   :  { %1585 = vmatprep.mubr.bf16.mxu0 %v729_v7  ;;  %1626 = vmatprep.mubr.bf16.mxu1 %v729_v7 }
 0x4b5   :  { %1555 = vmatprep.subr.bf16.mxu0 %v2106_v11  ;;  %1879 = vmatprep.subr.bf16.mxu1 %v2107_v12 }
 0x4b7   :  { %1556 = vmatpush1.bf16.msra.mxu0 %v2104_v13  ;;  %1880 = vmatpush3.bf16.msra.mxu1 %v2108_v14 }
 0x4b8   :  { %1557 = vmatprep.subr.bf16.mxu0 %v2111_v15  ;;  %1881 = vmatprep.subr.bf16.mxu1 %v2112_v16 }
 0x4bb   :  { %1558 = vmatpush1.bf16.msra.mxu0 %v2109_v17  ;;  %1882 = vmatpush3.bf16.msra.mxu1 %v2113_v18 }
 0x4bc   :  { %1559 = vmatprep.subr.bf16.mxu0 %v2116_v19  ;;  %1883 = vmatprep.subr.bf16.mxu1 %v2117_v20 }
 0x4bf   :  { %1560 = vmatpush1.bf16.msra.mxu0 %v2114_v21  ;;  %1884 = vmatpush3.bf16.msra.mxu1 %v2118_v22 }
 0x4c0   :  { %1561 = vmatprep.subr.bf16.mxu0 %v2121_v23  ;;  %1885 = vmatprep.subr.bf16.mxu1 %v2122_v24  ;;  %v886_v24 = vsub.s32 6, %v2556_v34 }
 0x4c3   :  { %1562 = vmatpush1.bf16.msra.mxu0 %v2119_v25  ;;  %1886 = vmatpush3.bf16.msra.mxu1 %v2123_v26 }
 0x4c4   :  { %1563 = vmatprep.subr.bf16.mxu0 %v2126_v27  ;;  %1887 = vmatprep.subr.bf16.mxu1 %v2127_v28 }
 0x4c7   :  { %1564 = vmatpush1.bf16.msra.mxu0 %v2124_v29  ;;  %1888 = vmatpush3.bf16.msra.mxu1 %v2128_v30  ;;  %v887_v29 = vrot.slane %v858_v59, %v886_v24 }
 0x4c8   :  { %1565 = vmatprep.subr.bf16.mxu0 %v2131_v31  ;;  %1889 = vmatprep.subr.bf16.mxu1 %v2132_v32 }
 0x4cb   :  { %1566 = vmatpush1.bf16.msra.mxu0 %v2129_v33  ;;  %1890 = vmatpush3.bf16.msra.mxu1 %v2133_v35 }
 0x4cc   :  { %1567 = vmatprep.subr.bf16.mxu0 %v2136_v37  ;;  %1891 = vmatprep.subr.bf16.mxu1 %v2137_v38 }
 0x4cf   :  { %1568 = vmatpush1.bf16.msra.mxu0 %v2134_v39  ;;  %1892 = vmatpush3.bf16.msra.mxu1 %v2138_v40  ;;  %v878_v40 = vsub.s32 4, %v2556_v34 }
 0x4d0   :  { %1569 = vmatprep.subr.bf16.mxu0 %v2141_v41  ;;  %v882_v41 = vsub.s32 5, %v2556_v34 }
 0x4d2   :  { %1627 = vmatmul.mubr.bf16.vlgmr.msra.gmra.mrb[12].mxu1 %v2603_v9 }
 0x4d3   :  { %1570 = vmatpush1.bf16.msra.mxu0 %v2139_v42  ;;  %v879_v42 = vrot.slane %v858_v59, %v878_v40 }
 0x4d4   :  { %1571 = vmatprep.subr.bf16.mxu0 %v2144_v43  ;;  %v883_v43 = vrot.slane %v858_v59, %v882_v41 }
 0x4d7   :  { %1572 = vmatpush1.bf16.msra.mxu0 %v2142_v44 }
 0x4d8   :  { %1573 = vmatprep.subr.bf16.mxu0 %v2147_v45 }
 0x4db   :  { %1574 = vmatpush1.bf16.msra.mxu0 %v2145_v46 }
 0x4dc   :  { %1575 = vmatprep.subr.bf16.mxu0 %v2150_v47 }
 0x4df   :  { %1576 = vmatpush1.bf16.msra.mxu0 %v2148_v48 }
 0x4e0   :  { %1577 = vmatprep.subr.bf16.mxu0 %v2153_v49 }
 0x4e3   :  { %1578 = vmatpush1.bf16.msra.mxu0 %v2151_v50 }
 0x4e4   :  { %1579 = vmatprep.subr.bf16.mxu0 %v2156_v51 }
 0x4e7   :  { %1580 = vmatpush1.bf16.msra.mxu0 %v2154_v52 }
 0x4e8   :  { %1581 = vmatprep.subr.bf16.mxu0 %v2159_v53 }
 0x4eb   :  { %1582 = vmatpush1.bf16.msra.mxu0 %v2157_v54 }
 0x4ec   :  { %1583 = vmatprep.subr.bf16.mxu0 %v2162_v55 }
 0x4ef   :  { %1584 = vmatpush1.bf16.msra.mxu0 %v2160_v56 }
 0x4f2   :  { %1586 = vmatmul.mubr.bf16.vlgmr.msra.gmra.mrb[12].mxu0 %v2603_v9 }
 0x585   :  { %v1505_v2 = vpop.f32.mrb[8].mxu0  ;;  %v1546_v3 = vpop.f32.mrb[8].mxu1 }
 0x586   :  { %v1506_v4 = vadd.f32 %v1505_v2, %v863_v61  ;;  %v1547_v5 = vadd.f32 %v1546_v3, %v871_v62  ;;  %v1507_v6 = vpop.f32.mrb[9].mxu0  ;;  %v1548_v0 = vpop.f32.mrb[9].mxu1 }
 0x587   :  { %v1508_v7 = vadd.f32 %v1507_v6, %v867_v63  ;;  %v1549_v8 = vadd.f32 %v1548_v0, %v875_v1  ;;  %v1509_v9 = vpop.f32.mrb[10].mxu0  ;;  %v1550_v10 = vpop.f32.mrb[10].mxu1 }
 0x588   :  { %v1850_v11 = vmul.f32 -1.442695, %v1506_v4  ;;  %v1852_v12 = vmul.f32 -1.442695, %v1547_v5  ;;  %v1510_v13 = vpop.f32.mrb[11].mxu0  ;;  %v1551_v14 = vpop.f32.mrb[11].mxu1 }
 0x589   :  { %v1851_v15 = vmul.f32 -1.442695, %v1508_v7  ;;  %v1853_v36 = vmul.f32 -1.442695, %v1549_v8 }
 0x58a   :  { %2173 = vpow2.f32 %v1850_v11 }
 0x58b   :  { %2175 = vpow2.f32 %v1852_v12 }
 0x58c   :  { %2177 = vpow2.f32 %v1851_v15 }
 0x58d   :  { %2179 = vpow2.f32 %v1853_v36 }
 0x594   :  { %v2174_v58 = vpop.eup %2173 }
 0x595   :  { %v2176_v16 = vpop.eup %2175  ;;  %v1655_v17 = vadd.f32 1.0, %v2174_v58 }
 0x596   :  { %v2178_v18 = vpop.eup %2177  ;;  %v1657_v19 = vadd.f32 1.0, %v2176_v16 }
 0x597   :  { %v2180_v20 = vpop.eup %2179  ;;  %2181 = vrcp.f32 %v1655_v17  ;;  %v1656_v21 = vadd.f32 1.0, %v2178_v18 }
 0x598   :  { %2183 = vrcp.f32 %v1657_v19  ;;  %v1658_v22 = vadd.f32 1.0, %v2180_v20 }
 0x599   :  { %2185 = vrcp.f32 %v1656_v21 }
 0x59a   :  { %2187 = vrcp.f32 %v1658_v22 }
 0x5a1   :  { %v2182_v23 = vpop.eup %2181 }
 0x5a2   :  { %v2184_v25 = vpop.eup %2183  ;;  %1676 = vst [vmem:[#allocation13] sm:$0xff] %v2182_v23 }
 0x5a3   :  { %v2186_v26 = vpop.eup %2185  ;;  %1678 = vst [vmem:[#allocation13 + $0x10] sm:$0xff] %v2184_v25 }
 0x5a4   :  { %v2188_v27 = vpop.eup %2187  ;;  %1677 = vst [vmem:[#allocation13 + $0x8] sm:$0xff] %v2186_v26 }
 0x5a5   :  { %1679 = vst [vmem:[#allocation13 + $0x18] sm:$0xff] %v2188_v27  ;;  %v1893_v28 = vpop.f32.mrb[12].mxu1 }
 0x5a6   :  { %v1894_v30 = vpop.f32.mrb[13].mxu1 }
 0x5a7   :  { %v1895_v31 = vadd.f32 %v1894_v30, %v1893_v28  ;;  %v1896_v32 = vpop.f32.mrb[14].mxu1 }
 0x5a8   :  { %v1897_v33 = vpop.f32.mrb[15].mxu1 }
 0x5a9   :  { %v1629_v35 = vadd.f32 %v1895_v31, %v887_v29 }
 0x5ab   :  { %v1856_v37 = vmul.f32 -1.442695, %v1629_v35 }
 0x5ad   :  { %2189 = vpow2.f32 %v1856_v37 }
 0x5b7   :  { %v2190_v38 = vpop.eup %2189 }
 0x5b8   :  { %v1661_v39 = vadd.f32 1.0, %v2190_v38 }
 0x5ba   :  { %2191 = vrcp.f32 %v1661_v39 }
 0x5c4   :  { %v2192_v44 = vpop.eup %2191 }
 0x5c5   :  { %1682 = vst [vmem:[#allocation13 + $0x30] sm:$0xff] %v2192_v44  ;;  %v1587_v45 = vpop.f32.mrb[12].mxu0 }
 0x5c6   :  { %v1588_v46 = vadd.f32 %v1587_v45, %v879_v42  ;;  %v1589_v47 = vpop.f32.mrb[13].mxu0 }
 0x5c7   :  { %v1590_v48 = vadd.f32 %v1589_v47, %v883_v43  ;;  %v1591_v49 = vpop.f32.mrb[14].mxu0 }
 0x5c8   :  { %v1854_v50 = vmul.f32 -1.442695, %v1588_v46  ;;  %v1592_v51 = vpop.f32.mrb[15].mxu0 }
 0x5c9   :  { %v1855_v52 = vmul.f32 -1.442695, %v1590_v48 }
 0x5ca   :  { %2193 = vpow2.f32 %v1854_v50 }
 0x5cb   :  { %2195 = vpow2.f32 %v1855_v52 }
 0x5d4   :  { %v2194_v53 = vpop.eup %2193 }
 0x5d5   :  { %v2196_v54 = vpop.eup %2195  ;;  %v1659_v55 = vadd.f32 1.0, %v2194_v53 }
 0x5d6   :  { %v1660_v56 = vadd.f32 1.0, %v2196_v54 }
 0x5d7   :  { %2197 = vrcp.f32 %v1659_v55 }
 0x5d8   :  { %2199 = vrcp.f32 %v1660_v56 }
 0x5e1   :  { %v2198_v34 = vpop.eup %2197 }
 0x5e2   :  { %v2200_v57 = vpop.eup %2199  ;;  %1680 = vst [vmem:[#allocation13 + $0x20] sm:$0xff] %v2198_v34 }
 0x5e3   :  { %1681 = vst [vmem:[#allocation13 + $0x28] sm:$0xff] %v2200_v57 }
 0x5e4   :  { %2344 = shalt.err (!%p2341_p10)
}
 0x5e5   :  { %s2649_s24 = sld [smem:[#allocation19_spill]] }
 0x5eb   :  { %s2345_s25 = scalar_lea.hbm %s2649_s24, 896 }
 0x5ec   :  { %p2346_p11 = scmp.ne.s32.totalorder %s2649_s24, %s2345_s25  ;;  %p2349_p12 = scmp.lt.u32.totalorder %s2345_s25, %s2649_s24 }
 0x5ee   :  { %p2351_p13 = pnand %p2349_p12, %p2346_p11 }
 0x5f0   :  { %2354 = shalt.err (!%p2351_p13)
}
 0x5f1   :  { %1692 = dma.vmem_to_hbm [thread:$0]  %s1690_s22, 896, %s2649_s24, [#allocation4]  }
 0x5f2   :  { %2363 = dma.done.wait [#allocation4], 896  }
 0x5f3   :  { %2364 = vsyncadd [#allocation4], 4294966400 }
 0x5f4   :  { %1696 = vsyncpa [#allocation3], 1 }
 0x5f5   :  { %1697 = vsyncpa [#allocation6], 1 }
 0x5f6   :  { %1698 = vsyncpa [#allocation9], 1 }
 0x5f7   :  { %1699 = vsyncpa [#allocation12], 1 }
 0x5f8   :  { %1700 = vsyncpa [#allocation4], 1 }

</bundles_post_ra>
